<compile_context>
chip_gen: v7x
topology: tpu7x:2x2x1
jax: 0.10.0
libtpu: 0.0.40
codegen_flags: <defaults>
</compile_context>

<pallas_src>
import jax
import jax.numpy as jnp
from jax import lax
from jax.experimental import pallas as pl
from jax.experimental.pallas import tpu as pltpu


def _downblock_kernel(x_ref, w_ref, scale_ref, shift_ref, o_ref):
    # x_ref:     (B, 4, Hp, Wp, Cin)  bf16  four 2x2-pooling-window slabs per image
    # w_ref:     (9*Cin, Cout_p)      bf16  conv weight, K order = (ky, kx, cin)
    # scale_ref: (1, Cout_p)          f32   folded BN scale = gamma / sqrt(var + eps)
    # shift_ref: (1, Cout_p)          f32   folded BN shift = beta - mean * scale
    # o_ref:     (B, Hp*Wp, Cout_p)   f32
    B, _, Hp, Wp, Cin = x_ref.shape
    Cout_p = o_ref.shape[2]

    xv = x_ref[...]                                                  # (B, 4, Hp, Wp, Cin)

    patch_rows = []
    for b in range(B):                                               # static unroll (B <= 8)
        # ---- MaxPool2d(2): elementwise max of the four window slabs (pure VPU) ----
        pooled = jnp.maximum(jnp.maximum(xv[b, 0], xv[b, 1]),
                             jnp.maximum(xv[b, 2], xv[b, 3]))        # (Hp, Wp, Cin)

        # ---- zero padding (padding=1) as a value: no scratch, no per-step zeroing ----
        zero_col = jnp.zeros((Hp, 1, Cin), dtype=pooled.dtype)
        padded = jnp.concatenate([zero_col, pooled, zero_col], axis=1)   # (Hp, Wp+2, Cin)
        zero_row = jnp.zeros((1, Wp + 2, Cin), dtype=pooled.dtype)
        padded = jnp.concatenate([zero_row, padded, zero_row], axis=0)   # (Hp+2, Wp+2, Cin)

        # ---- im2col: (Hp*Wp, 9*Cin) patch slab for this image ----
        taps = [padded[dy:dy + Hp, dx:dx + Wp, :]
                for dy in range(3) for dx in range(3)]               # each (Hp, Wp, Cin)
        patches = jnp.concatenate(taps, axis=2).reshape(Hp * Wp, 9 * Cin)
        patch_rows.append(patches)

    patches_all = patch_rows[0] if B == 1 else jnp.concatenate(patch_rows, axis=0)

    # ---- single MXU matmul for the whole step, f32 accumulation ----
    acc = jnp.dot(patches_all, w_ref[...],
                  preferred_element_type=jnp.float32)                # (B*Hp*Wp, Cout_p)

    # ---- folded BatchNorm + ReLU (Dropout == identity at inference), f32 epilogue ----
    y = acc * scale_ref[...] + shift_ref[...]
    y = jnp.maximum(y, 0.0)
    o_ref[...] = y.reshape(B, Hp * Wp, Cout_p).astype(o_ref.dtype)


def _pick_images_per_step(N, Hp, Wp, Cin, Cout_p):
    """Largest divisor B of N (<= 8) whose double-buffered x + out tiles fit a budget."""
    budget = 8 * 1024 * 1024  # bytes; well under the 32 MiB scoped-VMEM limit below
    best = 1
    for b in range(1, min(N, 8) + 1):
        if N % b:
            continue
        per_step = 2 * (b * 4 * Hp * Wp * Cin * 2        # bf16 input slabs (x2 buffers)
                        + b * Hp * Wp * Cout_p * 4)       # f32 output tile   (x2 buffers)
        if per_step <= budget:
            best = b
    return best


def downblock_pallas(x_nchw, w_oihw, gamma, beta, running_mean, running_var, eps=1e-5):
    """DownBlock forward. x_nchw: (N, Cin, H, W) f32 -> (N, Cout, H//2, W//2) f32."""
    N, Cin, H, W = x_nchw.shape
    Cout = w_oihw.shape[0]
    assert H % 2 == 0 and W % 2 == 0, "MaxPool2d(2) requires even spatial dims"
    Hp, Wp = H // 2, W // 2
    Cout_p = ((Cout + 127) // 128) * 128   # lane-dense output; padding sliced off below
    B = _pick_images_per_step(N, Hp, Wp, Cin, Cout_p)

    # ---- layout plumbing only (reshape / transpose / cast, no compute) ----
    # NCHW -> NHWC -> (N, 4, Hp, Wp, Cin): dim-1 indexes the 2x2 pooling-window slabs.
    x = jnp.transpose(x_nchw, (0, 2, 3, 1)).astype(jnp.float32)
    x = x.reshape(N, Hp, 2, Wp, 2, Cin)
    x = jnp.transpose(x, (0, 2, 4, 1, 3, 5))            # (N, 2, 2, Hp, Wp, Cin)
    x = x.reshape(N, 4, Hp, Wp, Cin).astype(jnp.bfloat16)

    # Conv weight OIHW -> HWIO -> (9*Cin, Cout), zero-padded to Cout_p columns, bf16.
    w = jnp.transpose(w_oihw, (2, 3, 1, 0)).astype(jnp.float32).reshape(9 * Cin, Cout)
    w = jnp.pad(w, ((0, 0), (0, Cout_p - Cout))).astype(jnp.bfloat16)

    # Folded BN affine in f32; padded columns are zero so padded outputs are relu(0)=0.
    scale = gamma.astype(jnp.float32) / jnp.sqrt(running_var.astype(jnp.float32) + eps)
    shift = beta.astype(jnp.float32) - running_mean.astype(jnp.float32) * scale
    scale = jnp.pad(scale, (0, Cout_p - Cout)).reshape(1, Cout_p)
    shift = jnp.pad(shift, (0, Cout_p - Cout)).reshape(1, Cout_p)

    out = pl.pallas_call(
        _downblock_kernel,
        out_shape=jax.ShapeDtypeStruct((N, Hp * Wp, Cout_p), jnp.float32),
        grid_spec=pltpu.PrefetchScalarGridSpec(
            num_scalar_prefetch=0,
            grid=(N // B,),
            in_specs=[
                pl.BlockSpec((B, 4, Hp, Wp, Cin), lambda n: (n, 0, 0, 0, 0)),
                pl.BlockSpec((9 * Cin, Cout_p), lambda n: (0, 0)),
                pl.BlockSpec((1, Cout_p), lambda n: (0, 0)),
                pl.BlockSpec((1, Cout_p), lambda n: (0, 0)),
            ],
            out_specs=pl.BlockSpec((B, Hp * Wp, Cout_p), lambda n: (n, 0, 0)),
        ),
        compiler_params=pltpu.CompilerParams(
            dimension_semantics=("parallel",),
            vmem_limit_bytes=32 * 1024 * 1024,
        ),
    )(x, w, scale, shift)

    # (N, Hp*Wp, Cout_p) -> NCHW, dropping the lane padding.
    out = out[:, :, :Cout].reshape(N, Hp, Wp, Cout)
    return jnp.transpose(out, (0, 3, 1, 2))


def downblock_reference(x_nchw, w_oihw, gamma, beta, running_mean, running_var, eps=1e-5):
    """Pure-JAX reference (NCHW), mirrors PyTorch eval-mode forward."""
    pooled = lax.reduce_window(
        x_nchw, -jnp.inf, lax.max,
        window_dimensions=(1, 1, 2, 2), window_strides=(1, 1, 2, 2), padding="VALID",
    )
    conv = lax.conv_general_dilated(
        pooled, w_oihw, window_strides=(1, 1), padding=((1, 1), (1, 1)),
        dimension_numbers=("NCHW", "OIHW", "NCHW"),
    )
    scale = gamma / jnp.sqrt(running_var + eps)
    shift = beta - running_mean * scale
    y = conv * scale[None, :, None, None] + shift[None, :, None, None]
    return jnp.maximum(y, 0.0)


if __name__ == "__main__":
    key = jax.random.PRNGKey(0)
    k_x, k_w, k_g, k_b, k_m, k_v = jax.random.split(key, 6)

    N, Cin, Cout, H, W = 2, 4, 8, 16, 16

    x = jax.random.normal(k_x, (N, Cin, H, W), dtype=jnp.float32)
    # Conv2d weight (Cout, Cin, 3, 3), no bias.
    w = jax.random.normal(k_w, (Cout, Cin, 3, 3), dtype=jnp.float32) * 0.1
    # BatchNorm2d parameters / running stats (deterministic synthetic values).
    gamma = 1.0 + 0.1 * jax.random.normal(k_g, (Cout,), dtype=jnp.float32)
    beta = 0.1 * jax.random.normal(k_b, (Cout,), dtype=jnp.float32)
    running_mean = 0.1 * jax.random.normal(k_m, (Cout,), dtype=jnp.float32)
    running_var = jnp.abs(jax.random.normal(k_v, (Cout,), dtype=jnp.float32)) + 0.5

    out = downblock_pallas(x, w, gamma, beta, running_mean, running_var)
    out = jax.block_until_ready(out)
    assert out.shape == (N, Cout, H // 2, W // 2), out.shape

    # Tight structural check: reference fed the same bf16-rounded x / w (kernel uses
    # bf16 inputs with f32 accumulation, so this should match to f32 rounding error).
    x_r = x.astype(jnp.bfloat16).astype(jnp.float32)
    w_r = w.astype(jnp.bfloat16).astype(jnp.float32)
    ref_bf = downblock_reference(x_r, w_r, gamma, beta, running_mean, running_var)
    assert jnp.allclose(out, ref_bf, atol=1e-3, rtol=1e-3), \
        float(jnp.max(jnp.abs(out - ref_bf)))

    # Loose sanity check against the full-f32 reference (only bf16 input rounding differs).
    ref_f32 = downblock_reference(x, w, gamma, beta, running_mean, running_var)
    assert jnp.allclose(out, ref_f32, atol=0.15, rtol=0.05), \
        float(jnp.max(jnp.abs(out - ref_f32)))

    print("KERNEL_OK")
</pallas_src>

<mosaic_0001>
module attributes {stable_mosaic.version = 11 : i64} {
  func.func @_downblock_kernel(%arg0: i32, %arg1: memref<2x4x8x8x4xbf16, #tpu.memory_space<vmem>>, %arg2: memref<36x128xbf16, #tpu.memory_space<vmem>>, %arg3: memref<1x128xf32, #tpu.memory_space<vmem>>, %arg4: memref<1x128xf32, #tpu.memory_space<vmem>>, %arg5: memref<2x64x128xf32, #tpu.memory_space<vmem>>) attributes {dimension_semantics = [#tpu.dimension_semantics<parallel>], iteration_bounds = array<i64: 1>, scalar_prefetch = 0 : i64, scratch_operands = 0 : i64, tpu.core_type = #tpu.core_type<tc>, window_params = [{transform_indices = @transform_0, window_bounds = array<i64: 2, 4, 8, 8, 4>}, {pipeline_mode = #tpu.pipeline_mode<synchronous>, transform_indices = @transform_1, window_bounds = array<i64: 36, 128>}, {pipeline_mode = #tpu.pipeline_mode<synchronous>, transform_indices = @transform_2, window_bounds = array<i64: 1, 128>}, {pipeline_mode = #tpu.pipeline_mode<synchronous>, transform_indices = @transform_3, window_bounds = array<i64: 1, 128>}, {transform_indices = @transform_4, window_bounds = array<i64: 2, 64, 128>}]} {
    %c0 = arith.constant 0 : index
    %c0_0 = arith.constant 0 : index
    %c0_1 = arith.constant 0 : index
    %c0_2 = arith.constant 0 : index
    %c0_3 = arith.constant 0 : index
    %0 = vector.load %arg1[%c0, %c0_0, %c0_1, %c0_2, %c0_3] : memref<2x4x8x8x4xbf16, #tpu.memory_space<vmem>>, vector<2x4x8x8x4xbf16>
    %1 = vector.extract_strided_slice %0 {offsets = [0, 0, 0, 0, 0], sizes = [1, 1, 8, 8, 4], strides = [1, 1, 1, 1, 1]} : vector<2x4x8x8x4xbf16> to vector<1x1x8x8x4xbf16>
    %2 = vector.shape_cast %1 : vector<1x1x8x8x4xbf16> to vector<8x8x4xbf16>
    %3 = vector.extract_strided_slice %0 {offsets = [0, 1, 0, 0, 0], sizes = [1, 1, 8, 8, 4], strides = [1, 1, 1, 1, 1]} : vector<2x4x8x8x4xbf16> to vector<1x1x8x8x4xbf16>
    %4 = vector.shape_cast %3 : vector<1x1x8x8x4xbf16> to vector<8x8x4xbf16>
    %5 = arith.maximumf %2, %4 : vector<8x8x4xbf16>
    %6 = vector.extract_strided_slice %0 {offsets = [0, 2, 0, 0, 0], sizes = [1, 1, 8, 8, 4], strides = [1, 1, 1, 1, 1]} : vector<2x4x8x8x4xbf16> to vector<1x1x8x8x4xbf16>
    %7 = vector.shape_cast %6 : vector<1x1x8x8x4xbf16> to vector<8x8x4xbf16>
    %8 = vector.extract_strided_slice %0 {offsets = [0, 3, 0, 0, 0], sizes = [1, 1, 8, 8, 4], strides = [1, 1, 1, 1, 1]} : vector<2x4x8x8x4xbf16> to vector<1x1x8x8x4xbf16>
    %9 = vector.shape_cast %8 : vector<1x1x8x8x4xbf16> to vector<8x8x4xbf16>
    %10 = arith.maximumf %7, %9 : vector<8x8x4xbf16>
    %11 = arith.maximumf %5, %10 : vector<8x8x4xbf16>
    %cst = arith.constant 0.000000e+00 : bf16
    %12 = vector.broadcast %cst : bf16 to vector<8x1x4xbf16>
    %13 = tpu.concatenate %12, %11, %12 in 1 : vector<8x1x4xbf16>, vector<8x8x4xbf16>, vector<8x1x4xbf16> -> vector<8x10x4xbf16>
    %cst_4 = arith.constant 0.000000e+00 : bf16
    %14 = vector.broadcast %cst_4 : bf16 to vector<1x10x4xbf16>
    %15 = tpu.concatenate %14, %13, %14 in 0 : vector<1x10x4xbf16>, vector<8x10x4xbf16>, vector<1x10x4xbf16> -> vector<10x10x4xbf16>
    %16 = vector.extract_strided_slice %15 {offsets = [0, 0, 0], sizes = [8, 8, 4], strides = [1, 1, 1]} : vector<10x10x4xbf16> to vector<8x8x4xbf16>
    %17 = vector.extract_strided_slice %15 {offsets = [0, 1, 0], sizes = [8, 8, 4], strides = [1, 1, 1]} : vector<10x10x4xbf16> to vector<8x8x4xbf16>
    %18 = vector.extract_strided_slice %15 {offsets = [0, 2, 0], sizes = [8, 8, 4], strides = [1, 1, 1]} : vector<10x10x4xbf16> to vector<8x8x4xbf16>
    %19 = vector.extract_strided_slice %15 {offsets = [1, 0, 0], sizes = [8, 8, 4], strides = [1, 1, 1]} : vector<10x10x4xbf16> to vector<8x8x4xbf16>
    %20 = vector.extract_strided_slice %15 {offsets = [1, 1, 0], sizes = [8, 8, 4], strides = [1, 1, 1]} : vector<10x10x4xbf16> to vector<8x8x4xbf16>
    %21 = vector.extract_strided_slice %15 {offsets = [1, 2, 0], sizes = [8, 8, 4], strides = [1, 1, 1]} : vector<10x10x4xbf16> to vector<8x8x4xbf16>
    %22 = vector.extract_strided_slice %15 {offsets = [2, 0, 0], sizes = [8, 8, 4], strides = [1, 1, 1]} : vector<10x10x4xbf16> to vector<8x8x4xbf16>
    %23 = vector.extract_strided_slice %15 {offsets = [2, 1, 0], sizes = [8, 8, 4], strides = [1, 1, 1]} : vector<10x10x4xbf16> to vector<8x8x4xbf16>
    %24 = vector.extract_strided_slice %15 {offsets = [2, 2, 0], sizes = [8, 8, 4], strides = [1, 1, 1]} : vector<10x10x4xbf16> to vector<8x8x4xbf16>
    %25 = tpu.concatenate %16, %17, %18, %19, %20, %21, %22, %23, %24 in 2 : vector<8x8x4xbf16>, vector<8x8x4xbf16>, vector<8x8x4xbf16>, vector<8x8x4xbf16>, vector<8x8x4xbf16>, vector<8x8x4xbf16>, vector<8x8x4xbf16>, vector<8x8x4xbf16>, vector<8x8x4xbf16> -> vector<8x8x36xbf16>
    %26 = vector.shape_cast %25 : vector<8x8x36xbf16> to vector<64x36xbf16>
    %27 = vector.extract_strided_slice %0 {offsets = [1, 0, 0, 0, 0], sizes = [1, 1, 8, 8, 4], strides = [1, 1, 1, 1, 1]} : vector<2x4x8x8x4xbf16> to vector<1x1x8x8x4xbf16>
    %28 = vector.shape_cast %27 : vector<1x1x8x8x4xbf16> to vector<8x8x4xbf16>
    %29 = vector.extract_strided_slice %0 {offsets = [1, 1, 0, 0, 0], sizes = [1, 1, 8, 8, 4], strides = [1, 1, 1, 1, 1]} : vector<2x4x8x8x4xbf16> to vector<1x1x8x8x4xbf16>
    %30 = vector.shape_cast %29 : vector<1x1x8x8x4xbf16> to vector<8x8x4xbf16>
    %31 = arith.maximumf %28, %30 : vector<8x8x4xbf16>
    %32 = vector.extract_strided_slice %0 {offsets = [1, 2, 0, 0, 0], sizes = [1, 1, 8, 8, 4], strides = [1, 1, 1, 1, 1]} : vector<2x4x8x8x4xbf16> to vector<1x1x8x8x4xbf16>
    %33 = vector.shape_cast %32 : vector<1x1x8x8x4xbf16> to vector<8x8x4xbf16>
    %34 = vector.extract_strided_slice %0 {offsets = [1, 3, 0, 0, 0], sizes = [1, 1, 8, 8, 4], strides = [1, 1, 1, 1, 1]} : vector<2x4x8x8x4xbf16> to vector<1x1x8x8x4xbf16>
    %35 = vector.shape_cast %34 : vector<1x1x8x8x4xbf16> to vector<8x8x4xbf16>
    %36 = arith.maximumf %33, %35 : vector<8x8x4xbf16>
    %37 = arith.maximumf %31, %36 : vector<8x8x4xbf16>
    %cst_5 = arith.constant 0.000000e+00 : bf16
    %38 = vector.broadcast %cst_5 : bf16 to vector<8x1x4xbf16>
    %39 = tpu.concatenate %38, %37, %38 in 1 : vector<8x1x4xbf16>, vector<8x8x4xbf16>, vector<8x1x4xbf16> -> vector<8x10x4xbf16>
    %cst_6 = arith.constant 0.000000e+00 : bf16
    %40 = vector.broadcast %cst_6 : bf16 to vector<1x10x4xbf16>
    %41 = tpu.concatenate %40, %39, %40 in 0 : vector<1x10x4xbf16>, vector<8x10x4xbf16>, vector<1x10x4xbf16> -> vector<10x10x4xbf16>
    %42 = vector.extract_strided_slice %41 {offsets = [0, 0, 0], sizes = [8, 8, 4], strides = [1, 1, 1]} : vector<10x10x4xbf16> to vector<8x8x4xbf16>
    %43 = vector.extract_strided_slice %41 {offsets = [0, 1, 0], sizes = [8, 8, 4], strides = [1, 1, 1]} : vector<10x10x4xbf16> to vector<8x8x4xbf16>
    %44 = vector.extract_strided_slice %41 {offsets = [0, 2, 0], sizes = [8, 8, 4], strides = [1, 1, 1]} : vector<10x10x4xbf16> to vector<8x8x4xbf16>
    %45 = vector.extract_strided_slice %41 {offsets = [1, 0, 0], sizes = [8, 8, 4], strides = [1, 1, 1]} : vector<10x10x4xbf16> to vector<8x8x4xbf16>
    %46 = vector.extract_strided_slice %41 {offsets = [1, 1, 0], sizes = [8, 8, 4], strides = [1, 1, 1]} : vector<10x10x4xbf16> to vector<8x8x4xbf16>
    %47 = vector.extract_strided_slice %41 {offsets = [1, 2, 0], sizes = [8, 8, 4], strides = [1, 1, 1]} : vector<10x10x4xbf16> to vector<8x8x4xbf16>
    %48 = vector.extract_strided_slice %41 {offsets = [2, 0, 0], sizes = [8, 8, 4], strides = [1, 1, 1]} : vector<10x10x4xbf16> to vector<8x8x4xbf16>
    %49 = vector.extract_strided_slice %41 {offsets = [2, 1, 0], sizes = [8, 8, 4], strides = [1, 1, 1]} : vector<10x10x4xbf16> to vector<8x8x4xbf16>
    %50 = vector.extract_strided_slice %41 {offsets = [2, 2, 0], sizes = [8, 8, 4], strides = [1, 1, 1]} : vector<10x10x4xbf16> to vector<8x8x4xbf16>
    %51 = tpu.concatenate %42, %43, %44, %45, %46, %47, %48, %49, %50 in 2 : vector<8x8x4xbf16>, vector<8x8x4xbf16>, vector<8x8x4xbf16>, vector<8x8x4xbf16>, vector<8x8x4xbf16>, vector<8x8x4xbf16>, vector<8x8x4xbf16>, vector<8x8x4xbf16>, vector<8x8x4xbf16> -> vector<8x8x36xbf16>
    %52 = vector.shape_cast %51 : vector<8x8x36xbf16> to vector<64x36xbf16>
    %53 = tpu.concatenate %26, %52 in 0 : vector<64x36xbf16>, vector<64x36xbf16> -> vector<128x36xbf16>
    %c0_7 = arith.constant 0 : index
    %c0_8 = arith.constant 0 : index
    %54 = vector.load %arg2[%c0_7, %c0_8] : memref<36x128xbf16, #tpu.memory_space<vmem>>, vector<36x128xbf16>
    %cst_9 = arith.constant dense<0.000000e+00> : vector<128x128xf32>
    %55 = tpu.matmul %53, %54, %cst_9 {dimension_numbers = #tpu.dot_dimension_numbers<[1], [0], [0], [1], [0, 0, 1, 1], [], []>} : vector<128x36xbf16>, vector<36x128xbf16>, vector<128x128xf32> -> vector<128x128xf32>
    %c0_10 = arith.constant 0 : index
    %c0_11 = arith.constant 0 : index
    %56 = vector.load %arg3[%c0_10, %c0_11] : memref<1x128xf32, #tpu.memory_space<vmem>>, vector<1x128xf32>
    %57 = vector.broadcast %56 : vector<1x128xf32> to vector<128x128xf32>
    %58 = arith.mulf %55, %57 : vector<128x128xf32>
    %c0_12 = arith.constant 0 : index
    %c0_13 = arith.constant 0 : index
    %59 = vector.load %arg4[%c0_12, %c0_13] : memref<1x128xf32, #tpu.memory_space<vmem>>, vector<1x128xf32>
    %60 = vector.broadcast %59 : vector<1x128xf32> to vector<128x128xf32>
    %61 = arith.addf %58, %60 : vector<128x128xf32>
    %cst_14 = arith.constant 0.000000e+00 : f32
    %62 = vector.broadcast %cst_14 : f32 to vector<128x128xf32>
    %63 = arith.maximumf %61, %62 : vector<128x128xf32>
    %64 = vector.shape_cast %63 : vector<128x128xf32> to vector<2x64x128xf32>
    %c0_15 = arith.constant 0 : index
    %c0_16 = arith.constant 0 : index
    %c0_17 = arith.constant 0 : index
    %65 = vector.load %arg5[%c0_15, %c0_16, %c0_17] : memref<2x64x128xf32, #tpu.memory_space<vmem>>, vector<2x64x128xf32>
    tpu.vector_store %arg5[%c0_15, %c0_16, %c0_17], %64 {strides = array<i32>} : memref<2x64x128xf32, #tpu.memory_space<vmem>>, vector<2x64x128xf32>,
    return
  }
  func.func @transform_0(%arg0: i32) -> (i32, i32, i32, i32, i32) {
    %c0_i32 = arith.constant 0 : i32
    %c0_i32_0 = arith.constant 0 : i32
    %c0_i32_1 = arith.constant 0 : i32
    %c0_i32_2 = arith.constant 0 : i32
    %c0_i32_3 = arith.constant 0 : i32
    return %arg0, %c0_i32, %c0_i32_0, %c0_i32_1, %c0_i32_2 : i32, i32, i32, i32, i32
  }
  func.func @transform_1(%arg0: i32) -> (i32, i32) {
    %c0_i32 = arith.constant 0 : i32
    %c0_i32_0 = arith.constant 0 : i32
    %c0_i32_1 = arith.constant 0 : i32
    return %c0_i32, %c0_i32_0 : i32, i32
  }
  func.func @transform_2(%arg0: i32) -> (i32, i32) {
    %c0_i32 = arith.constant 0 : i32
    %c0_i32_0 = arith.constant 0 : i32
    %c0_i32_1 = arith.constant 0 : i32
    return %c0_i32, %c0_i32_0 : i32, i32
  }
  func.func @transform_3(%arg0: i32) -> (i32, i32) {
    %c0_i32 = arith.constant 0 : i32
    %c0_i32_0 = arith.constant 0 : i32
    %c0_i32_1 = arith.constant 0 : i32
    return %c0_i32, %c0_i32_0 : i32, i32
  }
  func.func @transform_4(%arg0: i32) -> (i32, i32, i32) {
    %c0_i32 = arith.constant 0 : i32
    %c0_i32_0 = arith.constant 0 : i32
    %c0_i32_1 = arith.constant 0 : i32
    return %arg0, %c0_i32, %c0_i32_0 : i32, i32, i32
  }
}

</mosaic_0001>

<bundles_post_ra>
// kernel: tpu_custom_call.1
= control target key start
LH: loop header
LB: loop body
LE: loop exit
PB: predicated region body
PF: predicated region fallthrough
CT: control target
= control target key end

     0   :  { %v2467_v1 = vmov 0   ;;  %vm195_vm0 = vcmask 1040384   ;;  %vm206_vm1 = vcmask 1044480   ;;  %s1398_s23 = smov 8   ;;  %s1399_s24 = smov 4   ;;  %s2462_s0 = inlined_call_operand.vmem [shape: bf16[2,4,8,8,4], index: 0, kind: input, shape index: {}]   ;;  %s2463_s1 = inlined_call_operand.vmem [shape: bf16[36,128], index: 1, kind: input, shape index: {}]   ;;  %s2464_s2 = inlined_call_operand.vmem [shape: f32[1,128], index: 2, kind: input, shape index: {}]   ;;  %s2465_s3 = inlined_call_operand.vmem [shape: f32[1,128], index: 3, kind: input, shape index: {}]   ;;  %s2466_s4 = inlined_call_operand.hbm [shape: f32[2,64,128], index: 4, kind: output, shape index: {}]  }
   0x1   :  { %v51_v0 = vld [vmem:[%s2462_s0 + $0x80] sm:$0xf]  ;;  %v1437_v2 = vrot.slane %v2467_v1, 1  ;;  %vm196_vm2 = vsmask.f32 256 }
   0x2   :  { %v59_v3 = vld [vmem:[%s2462_s0 + $0xa0] sm:$0xf]  ;;  %vm207_vm3 = vsmask.f32 4352  ;;  %v21_v15 = vld [vmem:[%s2462_s0 + $0x8] sm:$0xf]  ;;  %vm1524_vm4 = vmand %vm195_vm0, %vm196_vm2 }
   0x3   :  { %v67_v4 = vld [vmem:[%s2462_s0 + $0xc0] sm:$0xf]  ;;  %v562_v6 = vmax.bf16 %v59_v3, %v51_v0  ;;  %305 = vrot.lane.b32.xlu1 %v1437_v2, %s1398_s23  ;;  %273 = vrot.lane.b32.xlu0 %v1437_v2, %s1399_s24  ;;  %v29_v16 = vld [vmem:[%s2462_s0 + $0x28] sm:$0xf]  ;;  %vm1530_vm5 = vmand %vm206_vm1, %vm207_vm3 }
   0x4   :  { %v75_v5 = vld [vmem:[%s2462_s0 + $0xe0] sm:$0xf]  ;;  %v37_v17 = vld [vmem:[%s2462_s0 + $0x48] sm:$0xf]  ;;  %v85_v19 = vmax.bf16 %v29_v16, %v21_v15  ;;  %v20_v20 = vld [vmem:[%s2462_s0 + $0x4] sm:$0xf] }
   0x5   :  { %v570_v7 = vmax.bf16 %v75_v5, %v67_v4  ;;  %v19_v8 = vld [vmem:[%s2462_s0] sm:$0xf]  ;;  %v45_v18 = vld [vmem:[%s2462_s0 + $0x68] sm:$0xf]  ;;  %v28_v21 = vld [vmem:[%s2462_s0 + $0x24] sm:$0xf] }
   0x6   :  { %v27_v9 = vld [vmem:[%s2462_s0 + $0x20] sm:$0xf]  ;;  %v93_v24 = vmax.bf16 %v45_v18, %v37_v17  ;;  %v36_v25 = vld [vmem:[%s2462_s0 + $0x44] sm:$0xf]  ;;  %v84_v27 = vmax.bf16 %v28_v21, %v20_v20  ;;  %v53_v37 = vld [vmem:[%s2462_s0 + $0x88] sm:$0xf] }
   0x7   :  { %v35_v10 = vld [vmem:[%s2462_s0 + $0x40] sm:$0xf]  ;;  %v83_v12 = vmax.bf16 %v27_v9, %v19_v8  ;;  %v578_v13 = vmax.bf16 %v570_v7, %v562_v6  ;;  %v44_v26 = vld [vmem:[%s2462_s0 + $0x64] sm:$0xf]  ;;  %v61_v38 = vld [vmem:[%s2462_s0 + $0xa8] sm:$0xf] }
   0x8   :  { %v43_v11 = vld [vmem:[%s2462_s0 + $0x60] sm:$0xf]  ;;  %v52_v28 = vld [vmem:[%s2462_s0 + $0x84] sm:$0xf]  ;;  %v92_v29 = vmax.bf16 %v44_v26, %v36_v25  ;;  %v101_v36 = vmax.bf16 %v93_v24, %v85_v19  ;;  %v69_v42 = vld [vmem:[%s2462_s0 + $0xc8] sm:$0xf]  ;;  %v564_v44 = vmax.bf16 %v61_v38, %v53_v37 }
   0x9   :  { %v91_v14 = vmax.bf16 %v43_v11, %v35_v10  ;;  %v1289_v22 = vcombine.low %v578_v13, %v578_v13  ;;  %v60_v30 = vld [vmem:[%s2462_s0 + $0xa4] sm:$0xf]  ;;  %v77_v43 = vld [vmem:[%s2462_s0 + $0xe8] sm:$0xf]  ;;  %v1515_v45 = vld [vmem:[%s2462_s0 + $0xc] sm:$0xf] }
   0xa   :  { %v68_v31 = vld [vmem:[%s2462_s0 + $0xc4] sm:$0xf]  ;;  %v100_v39 = vmax.bf16 %v92_v29, %v84_v27  ;;  %v563_v40 = vmax.bf16 %v60_v30, %v52_v28  ;;  %v1283_v49 = vcombine.low %v101_v36, %v101_v36  ;;  %v1520_v50 = vld [vmem:[%s2462_s0 + $0x2c] sm:$0xf]  ;;  %v572_v54 = vmax.bf16 %v77_v43, %v69_v42  ;;  %v23_v43 = vld [vmem:[%s2462_s0 + $0x10] sm:$0xf] }
   0xb   :  { %v99_v23 = vmax.bf16 %v91_v14, %v83_v12  ;;  %v76_v32 = vld [vmem:[%s2462_s0 + $0xe4] sm:$0xf]  ;;  %v611_v33 = vshrl.u32 %v1289_v22, 16  ;;  %v614_v34 = vshll.u32 %v1289_v22, 16  ;;  %v86_v63 = vmax.bf16 %v1520_v50, %v1515_v45  ;;  %v38_v6 = vld [vmem:[%s2462_s0 + $0x4c] sm:$0xf] }
   0xc   :  { %v571_v41 = vmax.bf16 %v76_v32, %v68_v31  ;;  %v1282_v52 = vcombine.low %v100_v39, %v100_v39  ;;  %v146_v58 = vshrl.u32 %v1283_v49, 16  ;;  %v149_v59 = vshll.u32 %v1283_v49, 16  ;;  %v46_v11 = vld [vmem:[%s2462_s0 + $0x6c] sm:$0xf]  ;;  %v39_v49 = vld [vmem:[%s2462_s0 + $0x50] sm:$0xf] }
   0xd   :  { %v1281_v35 = vcombine.low %v99_v23, %v99_v23  ;;  %v613_v46 = vrot.slane %v611_v33, 7  ;;  %v580_v5 = vmax.bf16 %v572_v54, %v564_v44  ;;  %v94_v23 = vmax.bf16 %v46_v11, %v38_v6  ;;  %v54_v39 = vld [vmem:[%s2462_s0 + $0x8c] sm:$0xf]  ;;  %v31_v44 = vld [vmem:[%s2462_s0 + $0x30] sm:$0xf] }
   0xe   :  { %v579_v53 = vmax.bf16 %v571_v41, %v563_v40  ;;  %v139_v60 = vshrl.u32 %v1282_v52, 16  ;;  %v142_v61 = vshll.u32 %v1282_v52, 16  ;;  %v148_v4 = vrot.slane %v146_v58, 7  ;;  %v62_v40 = vld [vmem:[%s2462_s0 + $0xac] sm:$0xf] }
   0xf   :  { %v132_v47 = vshrl.u32 %v1281_v35, 16  ;;  %v135_v48 = vshll.u32 %v1281_v35, 16  ;;  %v616_v56 = vor.u32 %v614_v34, %v613_v46  ;;  %v1291_v38 = vcombine.low %v580_v5, %v580_v5  ;;  %v70_v41 = vld [vmem:[%s2462_s0 + $0xcc] sm:$0xf] }
  0x10   :  { %v1290_v62 = vcombine.low %v579_v53, %v579_v53  ;;  %v141_v8 = vrot.slane %v139_v60, 7  ;;  %v151_v14 = vor.u32 %v149_v59, %v148_v4  ;;  %v78_v42 = vld [vmem:[%s2462_s0 + $0xec] sm:$0xf]  ;;  %v55_v59 = vld [vmem:[%s2462_s0 + $0x90] sm:$0xf]  ;;  %v565_v5 = vmax.bf16 %v62_v40, %v54_v39 }
  0x11   :  { %v134_v57 = vrot.slane %v132_v47, 7  ;;  %v674_v0 = vsel %vm1524_vm4, 0, %v616_v56  ;;  %v625_v54 = vshrl.u32 %v1291_v38, 16  ;;  %v47_v56 = vld [vmem:[%s2462_s0 + $0x70] sm:$0xf]  ;;  %v628_v58 = vshll.u32 %v1291_v38, 16 }
  0x12   :  { %v1543_v7 = vsel %vm1530_vm5, %v674_v0, 0  ;;  %v618_v9 = vshrl.u32 %v1290_v62, 16  ;;  %v621_v10 = vshll.u32 %v1290_v62, 16  ;;  %v144_v17 = vor.u32 %v142_v61, %v141_v8  ;;  %v63_v60 = vld [vmem:[%s2462_s0 + $0xb0] sm:$0xf] }
  0x13   :  { %v137_v3 = vor.u32 %v135_v48, %v134_v57  ;;  %v760_v12 = vrot.slane %v1543_v7, 1  ;;  %v691_v15 = vshrl.u32 %v1543_v7, 16  ;;  %v693_v18 = vshll.u32 %v1543_v7, 16  ;;  %v79_v4 = vld [vmem:[%s2462_s0 + $0xf0] sm:$0xf] }
  0x14   :  { %v620_v19 = vrot.slane %v618_v9, 7  ;;  %v200_v21 = vsel %vm1524_vm4, 0, %v151_v14  ;;  %v199_v25 = vsel %vm1524_vm4, 0, %v144_v17  ;;  %v102_v48 = vmax.bf16 %v94_v23, %v86_v63  ;;  %v25_v14 = vld [vmem:[%s2462_s0 + $0x18] sm:$0xf] }
  0x15   :  { %v198_v13 = vsel %vm1524_vm4, 0, %v137_v3  ;;  %767 = vrot.lane.b32.xlu1 %v760_v12, %s1398_s23  ;;  %v1566_v24 = vsel %vm1530_vm5, %v200_v21, 0  ;;  %v695_v26 = vrot.slane %v693_v18, 1  ;;  %v1578_v29 = vsel %vm1530_vm5, %v199_v25, 0  ;;  %v71_v3 = vld [vmem:[%s2462_s0 + $0xd0] sm:$0xf] }
  0x16   :  { %v1554_v16 = vsel %vm1530_vm5, %v198_v13, 0  ;;  %v623_v27 = vor.u32 %v621_v10, %v620_v19  ;;  %v1574_v28 = vrot.slane %v1566_v24, 1  ;;  %v1582_v32 = vrot.slane %v1578_v29, 1  ;;  %v41_v19 = vld [vmem:[%s2462_s0 + $0x58] sm:$0xf] }
  0x17   :  { %v298_v20 = vrot.slane %v1554_v16, 1  ;;  %v227_v22 = vshll.u32 %v1554_v16, 16  ;;  %v225_v30 = vshrl.u32 %v1554_v16, 16  ;;  %v1584_v33 = vor.u32 %v695_v26, %v691_v15  ;;  %v33_v15 = vld [vmem:[%s2462_s0 + $0x38] sm:$0xf] }
  0x18   :  { %v234_v34 = vshll.u32 %v1578_v29, 16  ;;  %v232_v35 = vshrl.u32 %v1578_v29, 16  ;;  %v241_v36 = vshll.u32 %v1566_v24, 16  ;;  %v675_v37 = vsel %vm1524_vm4, 0, %v623_v27  ;;  %v49_v21 = vld [vmem:[%s2462_s0 + $0x78] sm:$0xf] }
  0x19   :  { %307 = vrot.lane.b32.xlu0 %v298_v20, %s1398_s23  ;;  %v229_v31 = vrot.slane %v227_v22, 1  ;;  %311 = vrot.lane.b32.xlu1 %v1574_v28, %s1398_s23  ;;  %v239_v46 = vshrl.u32 %v1566_v24, 16  ;;  %v1614_v47 = vsel %vm1530_vm5, %v675_v37, 0  ;;  %v627_v63 = vrot.slane %v625_v54, 7 }
  0x1a   :  { %v236_v45 = vrot.slane %v234_v34, 1  ;;  %2483 = vst [vmem:[#allocation5_spill] sm:$0xff] %v1614_v47  ;;  %v243_v52 = vrot.slane %v241_v36, 1  ;;  %v700_v53 = vshll.u32 %v1614_v47, 16  ;;  %v698_v57 = vshrl.u32 %v1614_v47, 16 }
  0x1b   :  { %v1621_v50 = vor.u32 %v229_v31, %v225_v30  ;;  %v1284_v0 = vcombine.low %v102_v48, %v102_v48  ;;  %v573_v6 = vmax.bf16 %v78_v42, %v70_v41  ;;  %v87_v8 = vmax.bf16 %v31_v44, %v23_v43 }
  0x1c   :  { %v1636_v61 = vor.u32 %v236_v45, %v232_v35  ;;  %v702_v62 = vrot.slane %v700_v53, 1  ;;  %v95_v9 = vmax.bf16 %v47_v56, %v39_v49  ;;  %v1646_v10 = vor.u32 %v243_v52, %v239_v46 }
  0x1d   :  { %309 = vrot.lane.b32.xlu0 %v1582_v32, %s1398_s23  ;;  %739 = vrot.lane.b32.xlu1 %v1584_v33, %s1399_s24  ;;  %v630_v11 = vor.u32 %v628_v58, %v627_v63  ;;  %v566_v13 = vmax.bf16 %v63_v60, %v55_v59  ;;  %v574_v18 = vmax.bf16 %v79_v4, %v71_v3  ;;  %v153_v25 = vshrl.u32 %v1284_v0, 16 }
  0x1e   :  { %v103_v17 = vmax.bf16 %v95_v9, %v87_v8  ;;  %v1662_v22 = vor.u32 %v702_v62, %v698_v57  ;;  %v581_v27 = vmax.bf16 %v573_v6, %v565_v5 }
  0x1f   :  { %v676_v23 = vsel %vm1524_vm4, 0, %v630_v11  ;;  %v582_v31 = vmax.bf16 %v574_v18, %v566_v13 }
  0x20   :  { %v1668_v26 = vsel %vm1530_vm5, %v676_v23, 0  ;;  %v1285_v30 = vcombine.low %v103_v17, %v103_v17 }
  0x21   :  { %275 = vrot.lane.b32.xlu0 %v1621_v50, %s1399_s24  ;;  %277 = vrot.lane.b32.xlu1 %v1636_v61, %s1399_s24  ;;  %v705_v34 = vshrl.u32 %v1668_v26, 16  ;;  %v707_v35 = vshll.u32 %v1668_v26, 16 }
  0x25   :  { %279 = vrot.lane.b32.xlu0 %v1646_v10, %s1399_s24 }
  0x26   :  { %9 = vsyncpa [#allocation3], 0  ;;  %v160_v36 = vshrl.u32 %v1285_v30, 16  ;;  %v163_v37 = vshll.u32 %v1285_v30, 16  ;;  %v89_v38 = vmax.bf16 %v33_v15, %v25_v14  ;;  %v97_v39 = vmax.bf16 %v49_v21, %v41_v19  ;;  %v24_v40 = vld [vmem:[%s2462_s0 + $0x14] sm:$0xf]  ;;  %741 = vrot.lane.b32.xlu1 %v1662_v22, %s1399_s24 }
  0x27   :  { %v709_v41 = vrot.slane %v707_v35, 1  ;;  %v1293_v42 = vcombine.low %v582_v31, %v582_v31  ;;  %v32_v43 = vld [vmem:[%s2462_s0 + $0x34] sm:$0xf]  ;;  %v155_v45 = vrot.slane %v153_v25, 7  ;;  %v156_v46 = vshll.u32 %v1284_v0, 16  ;;  %s1400_s15 = smov 12  }
  0x28   :  { %v40_v44 = vld [vmem:[%s2462_s0 + $0x54] sm:$0xf]  ;;  %v1292_v48 = vcombine.low %v581_v27, %v581_v27  ;;  %v162_v49 = vrot.slane %v160_v36, 7  ;;  %v105_v58 = vmax.bf16 %v97_v39, %v89_v38  ;;  %v1695_v59 = vrot.slane %v1668_v26, 1  ;;  %v57_v11 = vld [vmem:[%s2462_s0 + $0x98] sm:$0xf] }
  0x29   :  { %v48_v52 = vld [vmem:[%s2462_s0 + $0x74] sm:$0xf]  ;;  %v1688_v53 = vor.u32 %v709_v41, %v705_v34  ;;  %v639_v54 = vshrl.u32 %v1293_v42, 16  ;;  %v642_v57 = vshll.u32 %v1293_v42, 16  ;;  %v88_v62 = vmax.bf16 %v32_v43, %v24_v40  ;;  %v65_v13 = vld [vmem:[%s2462_s0 + $0xb8] sm:$0xf] }
  0x2a   :  { %v165_v56 = vor.u32 %v163_v37, %v162_v49  ;;  %324 = vrot.lane.b32.xlu1 %v1578_v29, %s1400_s15  ;;  %v96_v63 = vmax.bf16 %v48_v52, %v40_v44  ;;  %v158_v0 = vor.u32 %v156_v46, %v155_v45  ;;  %v632_v3 = vshrl.u32 %v1292_v48, 16  ;;  %v73_v14 = vld [vmem:[%s2462_s0 + $0xd8] sm:$0xf]  ;;  %v56_v21 = vld [vmem:[%s2462_s0 + $0x94] sm:$0xf]  ;;  %s1401_s27 = smov 16  }
  0x2b   :  { %743 = vrot.lane.b32.xlu0 %v1688_v53, %s1399_s24  ;;  %v641_v60 = vrot.slane %v639_v54, 7  ;;  %v1287_v5 = vcombine.low %v105_v58, %v105_v58  ;;  %v1700_v6 = vrot.slane %v1614_v47, 1  ;;  %v81_v19 = vld [vmem:[%s2462_s0 + $0xf8] sm:$0xf]  ;;  %v635_v27 = vshll.u32 %v1292_v48, 16  ;;  %s1403_s28 = smov 24  }
  0x2c   :  { %v202_v4 = vsel %vm1524_vm4, 0, %v165_v56  ;;  %v104_v18 = vmax.bf16 %v96_v63, %v88_v62  ;;  %v201_v23 = vsel %vm1524_vm4, 0, %v158_v0  ;;  %v634_v25 = vrot.slane %v632_v3, 7  ;;  %v64_v31 = vld [vmem:[%s2462_s0 + $0xb4] sm:$0xf]  ;;  %s1404_s29 = smov 28  }
  0x2d   :  { %v1704_v8 = vsel %vm1530_vm5, %v202_v4, 0  ;;  %v644_v9 = vor.u32 %v642_v57, %v641_v60  ;;  %v174_v15 = vshrl.u32 %v1287_v5, 16  ;;  %v177_v17 = vshll.u32 %v1287_v5, 16  ;;  %v72_v38 = vld [vmem:[%s2462_s0 + $0xd4] sm:$0xf]  ;;  %s1405_s6 = smov 32  }
  0x2e   :  { %2484 = vst [vmem:[#allocation6_spill] sm:$0xff] %v1704_v8  ;;  %771 = vrot.lane.b32.xlu1 %v1695_v59, %s1398_s23  ;;  %v1286_v36 = vcombine.low %v104_v18, %v104_v18  ;;  %v568_v37 = vmax.bf16 %v65_v13, %v57_v11  ;;  %v80_v39 = vld [vmem:[%s2462_s0 + $0xf4] sm:$0xf]  ;;  %v26_v40 = vld [vmem:[%s2462_s0 + $0x1c] sm:$0xf]  ;;  %v576_v45 = vmax.bf16 %v81_v19, %v73_v14  ;;  %v1760_v49 = vsel %vm1530_vm5, %v201_v23, 0 }
  0x2f   :  { %322 = vrot.lane.b32.xlu0 %v1554_v16, %s1400_s15  ;;  %v678_v30 = vsel %vm1524_vm4, 0, %v644_v9  ;;  %v176_v35 = vrot.slane %v174_v15, 7  ;;  %v34_v41 = vld [vmem:[%s2462_s0 + $0x3c] sm:$0xf]  ;;  %2486 = vst [vmem:[#allocation8_spill] sm:$0xff] %v1760_v49  ;;  %v637_v52 = vor.u32 %v635_v27, %v634_v25  ;;  %v567_v54 = vmax.bf16 %v64_v31, %v56_v21 }
  0x30   :  { %v1734_v34 = vsel %vm1530_vm5, %v678_v30, 0  ;;  %v167_v43 = vshrl.u32 %v1286_v36, 16  ;;  %v170_v44 = vshll.u32 %v1286_v36, 16  ;;  %v42_v46 = vld [vmem:[%s2462_s0 + $0x5c] sm:$0xf]  ;;  %v575_v56 = vmax.bf16 %v80_v39, %v72_v38 }
  0x31   :  { %2485 = vst [vmem:[#allocation7_spill] sm:$0xff] %v1734_v34  ;;  %v179_v42 = vor.u32 %v177_v17, %v176_v35  ;;  %v50_v48 = vld [vmem:[%s2462_s0 + $0x7c] sm:$0xf]  ;;  %v584_v60 = vmax.bf16 %v576_v45, %v568_v37  ;;  %v90_v62 = vmax.bf16 %v34_v41, %v26_v40  ;;  %v677_v15 = vsel %vm1524_vm4, 0, %v637_v52 }
  0x32   :  { %784 = vrot.lane.b32.xlu1 %v1614_v47, %s1400_s15  ;;  %v169_v58 = vrot.slane %v167_v43, 7  ;;  %v583_v0 = vmax.bf16 %v575_v56, %v567_v54  ;;  %v98_v3 = vmax.bf16 %v50_v48, %v42_v46  ;;  %v58_v13 = vld [vmem:[%s2462_s0 + $0x9c] sm:$0xf]  ;;  %v248_v35 = vshll.u32 %v1760_v49, 16 }
  0x33   :  { %769 = vrot.lane.b32.xlu0 %v1700_v6, %s1398_s23  ;;  %v204_v57 = vsel %vm1524_vm4, 0, %v179_v42  ;;  %v1295_v5 = vcombine.low %v584_v60, %v584_v60  ;;  %v66_v14 = vld [vmem:[%s2462_s0 + $0xbc] sm:$0xf]  ;;  %v1799_v38 = vsel %vm1530_vm5, %v677_v15, 0  ;;  %v246_v46 = vshrl.u32 %v1760_v49, 16 }
  0x34   :  { %v1766_v63 = vsel %vm1530_vm5, %v204_v57, 0  ;;  %v172_v4 = vor.u32 %v170_v44, %v169_v58  ;;  %v1294_v9 = vcombine.low %v583_v0, %v583_v0  ;;  %v106_v11 = vmax.bf16 %v98_v3, %v90_v62  ;;  %v74_v21 = vld [vmem:[%s2462_s0 + $0xdc] sm:$0xf]  ;;  %2489 = vst [vmem:[#allocation11_spill] sm:$0xff] %v1799_v38 }
  0x35   :  { %2487 = vst [vmem:[#allocation9_spill] sm:$0xff] %v1766_v63  ;;  %v653_v18 = vshrl.u32 %v1295_v5, 16  ;;  %v656_v19 = vshll.u32 %v1295_v5, 16  ;;  %v82_v31 = vld [vmem:[%s2462_s0 + $0xfc] sm:$0xf]  ;;  %v569_v37 = vmax.bf16 %v66_v14, %v58_v13  ;;  %v250_v48 = vrot.slane %v248_v35, 1 }
  0x36   :  { %328 = vrot.lane.b32.xlu1 %v1760_v49, %s1400_s15  ;;  %v203_v17 = vsel %vm1524_vm4, 0, %v172_v4  ;;  %v646_v25 = vshrl.u32 %v1294_v9, 16  ;;  %v649_v27 = vshll.u32 %v1294_v9, 16  ;;  %v1288_v30 = vcombine.low %v106_v11, %v106_v11  ;;  %s1402_s0 = smov 20  }
  0x37   :  { %782 = vrot.lane.b32.xlu0 %v1543_v7, %s1400_s15  ;;  %v1787_v23 = vsel %vm1530_vm5, %v203_v17, 0  ;;  %v655_v36 = vrot.slane %v653_v18, 7  ;;  %v577_v43 = vmax.bf16 %v82_v31, %v74_v21  ;;  %v1824_v62 = vor.u32 %v250_v48, %v246_v46 }
  0x38   :  { %2488 = vst [vmem:[#allocation10_spill] sm:$0xff] %v1787_v23  ;;  %v648_v39 = vrot.slane %v646_v25, 7  ;;  %v181_v40 = vshrl.u32 %v1288_v30, 16  ;;  %v184_v41 = vshll.u32 %v1288_v30, 16  ;;  %v714_v0 = vshll.u32 %v1799_v38, 16 }
  0x39   :  { %v658_v42 = vor.u32 %v656_v19, %v655_v36  ;;  %v585_v54 = vmax.bf16 %v577_v43, %v569_v37  ;;  %v712_v11 = vshrl.u32 %v1799_v38, 16  ;;  %v1858_v51 = vrot.slane %v1760_v49, 1 }
  0x3a   :  { %347 = vrot.lane.b32.xlu1 %v1636_v61, %s1401_s27  ;;  %v651_v44 = vor.u32 %v649_v27, %v648_v39  ;;  %v183_v45 = vrot.slane %v181_v40, 7  ;;  %v716_v13 = vrot.slane %v714_v0, 1  ;;  %v1870_v55 = vrot.slane %v1799_v38, 1  ;;  %v1370_v27 = vld [vmem:[%s2463_s1] sm:$0xff]  }
  0x3b   :  { %326 = vrot.lane.b32.xlu0 %v1566_v24, %s1400_s15  ;;  %v680_v52 = vsel %vm1524_vm4, 0, %v658_v42  ;;  %v1296_v4 = vcombine.low %v585_v54, %v585_v54  ;;  %1329 = vmatprep.subr.bf16.mxu0 %v1370_v27  ;;  %vm1086_vm6 = vcmask 1041408   ;;  %v1938_v35 = vrot.slane %v1704_v8, 1 }
  0x3c   :  { %v1810_v56 = vsel %vm1530_vm5, %v680_v52, 0  ;;  %v679_v57 = vsel %vm1524_vm4, 0, %v651_v44  ;;  %v186_v58 = vor.u32 %v184_v41, %v183_v45  ;;  %v1840_v17 = vor.u32 %v716_v13, %v712_v11  ;;  %1351 = vmatprep.subr.bf16.mxu1 %v1370_v27  ;;  %1330 = vmatpush3.bf16.msra.mxu0 %v1370_v27 }
  0x3d   :  { %2490 = vst [vmem:[#allocation12_spill] sm:$0xff] %v1810_v56  ;;  %v660_v5 = vshrl.u32 %v1296_v4, 16  ;;  %v663_v9 = vshll.u32 %v1296_v4, 16  ;;  %1354 = vmatpush3.bf16.msra.mxu1 %v1370_v27  ;;  %v1958_v40 = vrot.slane %v1734_v34, 1  ;;  %v267_v41 = vshrl.u32 %v1766_v63, 16 }
  0x3e   :  { %788 = vrot.lane.b32.xlu1 %v1799_v38, %s1400_s15  ;;  %v205_v60 = vsel %vm1524_vm4, 0, %v186_v58  ;;  %v262_v43 = vshll.u32 %v1787_v23, 16  ;;  %v260_v48 = vshrl.u32 %v1787_v23, 16  ;;  %v735_v54 = vshll.u32 %v1810_v56, 16 }
  0x3f   :  { %345 = vrot.lane.b32.xlu0 %v1621_v50, %s1401_s27  ;;  %v1816_v50 = vsel %vm1530_vm5, %v679_v57, 0  ;;  %v1829_v3 = vsel %vm1530_vm5, %v205_v60, 0  ;;  %v662_v14 = vrot.slane %v660_v5, 7  ;;  %v2036_v27 = vrot.slane %v1810_v56, 1 }
  0x40   :  { %v264_v52 = vrot.slane %v262_v43, 1  ;;  %v737_v0 = vrot.slane %v735_v54, 1  ;;  %v728_v4 = vshll.u32 %v1816_v50, 16  ;;  %v726_v11 = vshrl.u32 %v1816_v50, 16 }
  0x41   :  { %v665_v15 = vor.u32 %v663_v9, %v662_v14  ;;  %vm426_vm7 = vcmask 31744   ;;  %vm460_vm8 = vcmask 97280   ;;  %vm443_vm9 = vcmask 64512  }
  0x42   :  { %807 = vrot.lane.b32.xlu1 %v1662_v22, %s1401_s27  ;;  %v1982_v60 = vor.u32 %v264_v52, %v260_v48  ;;  %v730_v13 = vrot.slane %v728_v4, 1  ;;  %v341_v52 = vshll.u32 %v1829_v3, 16  ;;  %vm477_vm10 = vcmask 130048  }
  0x43   :  { %786 = vrot.lane.b32.xlu0 %v1668_v26, %s1400_s15  ;;  %vm494_vm11 = vcmask 162816   ;;  %vm511_vm12 = vcmask 195584   ;;  %vm528_vm13 = vcmask 228352   ;;  %vm545_vm14 = vcmask 261120  }
  0x44   :  { %v343_v4 = vrot.slane %v341_v52, 1  ;;  %vm1061_vm15 = vcmask 293888  }
  0x46   :  { %351 = vrot.lane.b32.xlu1 %v1824_v62, %s1401_s27 }
  0x47   :  { %805 = vrot.lane.b32.xlu0 %v1584_v33, %s1401_s27  ;;  %v681_v33 = vsel %vm1524_vm4, 0, %v665_v15 }
  0x48   :  { %v1846_v18 = vsel %vm1530_vm5, %v681_v33, 0 }
  0x49   :  { %v799_v52 = vshrl.u32 %v1846_v18, 16 }
  0x4a   :  { %364 = vrot.lane.b32.xlu1 %v1582_v32, %s1402_s0 }
  0x4b   :  { %349 = vrot.lane.b32.xlu0 %v1646_v10, %s1401_s27 }
  0x4e   :  { %811 = vrot.lane.b32.xlu1 %v1840_v17, %s1401_s27 }
  0x4f   :  { %362 = vrot.lane.b32.xlu0 %v298_v20, %s1402_s0  ;;  %v253_v20 = vshrl.u32 %v1704_v8, 16 }
  0x52   :  { %824 = vrot.lane.b32.xlu1 %v1700_v6, %s1402_s0 }
  0x53   :  { %809 = vrot.lane.b32.xlu0 %v1688_v53, %s1401_s27 }
  0x56   :  { %368 = vrot.lane.b32.xlu1 %v1858_v51, %s1402_s0 }
  0x57   :  { %822 = vrot.lane.b32.xlu0 %v760_v12, %s1402_s0  ;;  %v255_v12 = vshll.u32 %v1704_v8, 16 }
  0x59   :  { %v257_v19 = vrot.slane %v255_v12, 1 }
  0x5a   :  { %380 = vrot.lane.b32.xlu1 %v1566_v24, %s1403_s28 }
  0x5b   :  { %366 = vrot.lane.b32.xlu0 %v1574_v28, %s1402_s0  ;;  %v1898_v21 = vor.u32 %v257_v19, %v253_v20  ;;  %v2014_v20 = vrot.slane %v1766_v63, 1 }
  0x5e   :  { %828 = vrot.lane.b32.xlu1 %v1870_v55, %s1402_s0 }
  0x5f   :  { %378 = vrot.lane.b32.xlu0 %v1578_v29, %s1403_s28 }
  0x62   :  { %840 = vrot.lane.b32.xlu1 %v1668_v26, %s1403_s28 }
  0x63   :  { %826 = vrot.lane.b32.xlu0 %v1695_v59, %s1402_s0 }
  0x66   :  { %384 = vrot.lane.b32.xlu1 %v1704_v8, %s1403_s28 }
  0x67   :  { %838 = vrot.lane.b32.xlu0 %v1614_v47, %s1403_s28 }
  0x6a   :  { %396 = vrot.lane.b32.xlu1 %v1646_v10, %s1404_s29  ;;  %v721_v10 = vshll.u32 %v1734_v34, 16 }
  0x6b   :  { %382 = vrot.lane.b32.xlu0 %v1760_v49, %s1403_s28 }
  0x6c   :  { %v723_v25 = vrot.slane %v721_v10, 1  ;;  %v2025_v10 = vrot.slane %v1787_v23, 1 }
  0x6e   :  { %844 = vrot.lane.b32.xlu1 %v1734_v34, %s1403_s28 }
  0x6f   :  { %394 = vrot.lane.b32.xlu0 %v1636_v61, %s1404_s29  ;;  %v719_v61 = vshrl.u32 %v1734_v34, 16 }
  0x72   :  { %854 = vrot.lane.b32.xlu1 %v1688_v53, %s1404_s29  ;;  %v1371_v53 = vld [vmem:[%s2463_s1 + $0x8] sm:$0xff]  }
  0x73   :  { %842 = vrot.lane.b32.xlu0 %v1799_v38, %s1403_s28  ;;  %1331 = vmatprep.subr.bf16.mxu0 %v1371_v53 }
  0x74   :  { %1352 = vmatprep.subr.bf16.mxu1 %v1371_v53  ;;  %1332 = vmatpush3.bf16.msra.mxu0 %v1371_v53 }
  0x75   :  { %1355 = vmatpush3.bf16.msra.mxu1 %v1371_v53  ;;  %v1931_v31 = vpop.permute.xlu0 %273 }
  0x76   :  { %400 = vrot.lane.b32.xlu1 %v1898_v21, %s1404_s29 }
  0x77   :  { %852 = vrot.lane.b32.xlu0 %v1662_v22, %s1404_s29  ;;  %v1913_v22 = vor.u32 %v723_v25, %v719_v61 }
  0x7a   :  { %412 = vrot.lane.b32.xlu1 %v1574_v28, %s1405_s6  ;;  %v1372_v28 = vld [vmem:[%s2463_s1 + $0x10] ss:$0 sps:$4 sm:$0x33]  }
  0x7b   :  { %398 = vrot.lane.b32.xlu0 %v1824_v62, %s1404_s29  ;;  %1357 = vmatprep.subr.msk.bf16.mxu0 %vm1086_vm6, %v1372_v28  ;;  %v1088_v30 = vsel %vm1086_vm6, %v1372_v28, 0 }
  0x7c   :  { %1358 = vmatprep.subr.msk.bf16.mxu1 %vm1086_vm6, %v1372_v28  ;;  %1334 = vmatpush3.bf16.msra.mxu0 %v1088_v30  ;;  %v2047_v28 = vrot.slane %v1816_v50, 1 }
  0x7d   :  { %1356 = vmatpush3.bf16.msra.mxu1 %v1088_v30 }
  0x7e   :  { %858 = vrot.lane.b32.xlu1 %v1913_v22, %s1404_s29  ;;  %2492 = vst [vmem:[#allocation14_spill] sm:$0xff] %v2047_v28 }
  0x7f   :  { %410 = vrot.lane.b32.xlu0 %v1582_v32, %s1405_s6  ;;  %v1929_v32 = vpop.permute.xlu1 %305 }
  0x82   :  { %868 = vrot.lane.b32.xlu1 %v1695_v59, %s1405_s6  ;;  %v269_v59 = vshll.u32 %v1766_v63, 16 }
  0x83   :  { %856 = vrot.lane.b32.xlu0 %v1840_v17, %s1404_s29 }
  0x84   :  { %v271_v42 = vrot.slane %v269_v59, 1 }
  0x86   :  { %283 = vrot.lane.b32.xlu1 %v1898_v21, %s1399_s24  ;;  %v1970_v46 = vor.u32 %v271_v42, %v267_v41 }
  0x87   :  { %866 = vrot.lane.b32.xlu0 %v1700_v6, %s1405_s6  ;;  %v1940_v36 = vpop.permute.xlu1 %767 }
  0x8a   :  { %416 = vrot.lane.b32.xlu1 %v1938_v35, %s1405_s6 }
  0x8b   :  { %281 = vrot.lane.b32.xlu0 %v1824_v62, %s1399_s24  ;;  %v1944_v37 = vpop.permute.xlu0 %307  ;;  %v1949_v39 = vpop.permute.xlu1 %311  ;;  %v733_v62 = vshrl.u32 %v1810_v56, 16 }
  0x8d   :  { %v1992_v9 = vor.u32 %v737_v0, %v733_v62  ;;  %v339_v0 = vshrl.u32 %v1829_v3, 16 }
  0x8e   :  { %747 = vrot.lane.b32.xlu1 %v1913_v22, %s1399_s24 }
  0x8f   :  { %414 = vrot.lane.b32.xlu0 %v1858_v51, %s1405_s6  ;;  %v1953_v6 = vpop.permute.xlu0 %309  ;;  %v1962_v44 = vpop.permute.xlu1 %739  ;;  %v2091_v1 = vor.u32 %v343_v4, %v339_v0 }
  0x92   :  { %872 = vrot.lane.b32.xlu1 %v1958_v40, %s1405_s6 }
  0x93   :  { %745 = vrot.lane.b32.xlu0 %v1840_v17, %s1399_s24  ;;  %v1966_v45 = vpop.permute.xlu0 %275  ;;  %v1974_v57 = vpop.permute.xlu1 %277  ;;  %v2003_v17 = vor.u32 %v730_v13, %v726_v11 }
  0x96   :  { %287 = vrot.lane.b32.xlu1 %v1970_v46, %s1399_s24 }
  0x97   :  { %870 = vrot.lane.b32.xlu0 %v1870_v55, %s1405_s6  ;;  %v1978_v58 = vpop.permute.xlu0 %279 }
  0x98   :  { %v1986_v5 = vpop.permute.xlu1 %741 }
  0x9a   :  { %315 = vrot.lane.b32.xlu1 %v1938_v35, %s1398_s23 }
  0x9b   :  { %285 = vrot.lane.b32.xlu0 %v1982_v60, %s1399_s24 }
  0x9c   :  { %v1997_v15 = vpop.permute.xlu1 %324 }
  0x9d   :  { %v1995_v14 = vpop.permute.xlu0 %743 }
  0x9e   :  { %751 = vrot.lane.b32.xlu1 %v1992_v9, %s1399_s24 }
  0x9f   :  { %313 = vrot.lane.b32.xlu0 %v1858_v51, %s1398_s23 }
  0xa0   :  { %v2007_v12 = vpop.permute.xlu1 %771 }
  0xa1   :  { %v2005_v33 = vpop.permute.xlu0 %322 }
  0xa2   :  { %775 = vrot.lane.b32.xlu1 %v1958_v40, %s1398_s23 }
  0xa3   :  { %749 = vrot.lane.b32.xlu0 %v2003_v17, %s1399_s24 }
  0xa4   :  { %v2018_v51 = vpop.permute.xlu1 %784 }
  0xa5   :  { %v2016_v19 = vpop.permute.xlu0 %769 }
  0xa6   :  { %2491 = vst [vmem:[#allocation13_spill] sm:$0xff] %v2016_v19  ;;  %319 = vrot.lane.b32.xlu1 %v2014_v20, %s1398_s23 }
  0xa7   :  { %773 = vrot.lane.b32.xlu0 %v1870_v55, %s1398_s23 }
  0xa8   :  { %v2029_v25 = vpop.permute.xlu1 %328 }
  0xa9   :  { %v2027_v61 = vpop.permute.xlu0 %782 }
  0xaa   :  { %332 = vrot.lane.b32.xlu1 %v1787_v23, %s1400_s15 }
  0xab   :  { %317 = vrot.lane.b32.xlu0 %v2025_v10, %s1398_s23 }
  0xac   :  { %v2040_v53 = vpop.permute.xlu1 %347 }
  0xad   :  { %v2038_v55 = vpop.permute.xlu0 %326 }
  0xae   :  { %779 = vrot.lane.b32.xlu1 %v2036_v27, %s1398_s23 }
  0xaf   :  { %330 = vrot.lane.b32.xlu0 %v1704_v8, %s1400_s15 }
  0xb0   :  { %v2051_v59 = vpop.permute.xlu1 %788 }
  0xb1   :  { %v2049_v30 = vpop.permute.xlu0 %345  ;;  %2493 = vst [vmem:[#allocation15_spill] sm:$0xff] %v2051_v59 }
  0xb2   :  { %792 = vrot.lane.b32.xlu1 %v1816_v50, %s1400_s15 }
  0xb3   :  { %777 = vrot.lane.b32.xlu0 %v2047_v28, %s1398_s23 }
  0xb4   :  { %v2059_v42 = vpop.permute.xlu1 %807 }
  0xb5   :  { %v2057_v41 = vpop.permute.xlu0 %786 }
  0xb6   :  { %2494 = vst [vmem:[#allocation16_spill] sm:$0xff] %v2057_v41  ;;  %336 = vrot.lane.b32.xlu1 %v1829_v3, %s1400_s15 }
  0xb7   :  { %790 = vrot.lane.b32.xlu0 %v1734_v34, %s1400_s15 }
  0xb8   :  { %v2067_v48 = vpop.permute.xlu1 %351 }
  0xb9   :  { %v2065_v43 = vpop.permute.xlu0 %805 }
  0xba   :  { %355 = vrot.lane.b32.xlu1 %v1982_v60, %s1401_s27 }
  0xbb   :  { %334 = vrot.lane.b32.xlu0 %v1766_v63, %s1400_s15 }
  0xbc   :  { %v2076_v62 = vpop.permute.xlu1 %364 }
  0xbd   :  { %v2074_v54 = vpop.permute.xlu0 %349 }
  0xbe   :  { %796 = vrot.lane.b32.xlu1 %v1846_v18, %s1400_s15 }
  0xbf   :  { %353 = vrot.lane.b32.xlu0 %v1898_v21, %s1401_s27  ;;  %v801_v21 = vshll.u32 %v1846_v18, 16 }
  0xc0   :  { %v2085_v13 = vpop.permute.xlu1 %811 }
  0xc1   :  { %v2083_v11 = vpop.permute.xlu0 %362  ;;  %2495 = vst [vmem:[#allocation17_spill] sm:$0xff] %v2085_v13  ;;  %v803_v49 = vrot.slane %v801_v21, 1 }
  0xc2   :  { %815 = vrot.lane.b32.xlu1 %v2003_v17, %s1401_s27 }
  0xc3   :  { %794 = vrot.lane.b32.xlu0 %v1810_v56, %s1400_s15  ;;  %v2111_v0 = vor.u32 %v803_v49, %v799_v52  ;;  %v2473_v49 = vrot.slane %v1829_v3, 1 }
  0xc4   :  { %v2096_v34 = vpop.permute.xlu1 %824 }
  0xc5   :  { %v2094_v38 = vpop.permute.xlu0 %809 }
  0xc6   :  { %2496 = vst [vmem:[#allocation18_spill] sm:$0xff] %v2094_v38  ;;  %359 = vrot.lane.b32.xlu1 %v2091_v1, %s1401_s27 }
  0xc7   :  { %813 = vrot.lane.b32.xlu0 %v1913_v22, %s1401_s27 }
  0xc8   :  { %v2105_v41 = vpop.permute.xlu1 %368 }
  0xc9   :  { %v2103_v8 = vpop.permute.xlu0 %822 }
  0xca   :  { %372 = vrot.lane.b32.xlu1 %v2025_v10, %s1402_s0 }
  0xcb   :  { %357 = vrot.lane.b32.xlu0 %v1970_v46, %s1401_s27 }
  0xcc   :  { %v381_v22 = vpop.permute.xlu1 %380 }
  0xcd   :  { %v2113_v4 = vpop.permute.xlu0 %366 }
  0xce   :  { %819 = vrot.lane.b32.xlu1 %v2111_v0, %s1401_s27 }
  0xcf   :  { %370 = vrot.lane.b32.xlu0 %v1938_v35, %s1402_s0 }
  0xd0   :  { %v2119_v38 = vpop.permute.xlu1 %828 }
  0xd1   :  { %v379_v21 = vpop.permute.xlu0 %378  ;;  %2497 = vst [vmem:[#allocation19_spill] sm:$0xff] %v2119_v38 }
  0xd2   :  { %832 = vrot.lane.b32.xlu1 %v2047_v28, %s1402_s0 }
  0xd3   :  { %817 = vrot.lane.b32.xlu0 %v1992_v9, %s1401_s27 }
  0xd4   :  { %v2128_v13 = vpop.permute.xlu1 %840 }
  0xd5   :  { %v2126_v52 = vpop.permute.xlu0 %826 }
  0xd6   :  { %2498 = vst [vmem:[#allocation20_spill] sm:$0xff] %v2126_v52  ;;  %376 = vrot.lane.b32.xlu1 %v2473_v49, %s1402_s0  ;;  %v2476_v52 = vrot.slane %v1846_v18, 1 }
  0xd7   :  { %830 = vrot.lane.b32.xlu0 %v1958_v40, %s1402_s0 }
  0xd8   :  { %v2137_v38 = vpop.permute.xlu1 %384 }
  0xd9   :  { %v2135_v35 = vpop.permute.xlu0 %838 }
  0xda   :  { %388 = vrot.lane.b32.xlu1 %v1766_v63, %s1403_s28 }
  0xdb   :  { %374 = vrot.lane.b32.xlu0 %v2014_v20, %s1402_s0 }
  0xdc   :  { %v397_v28 = vpop.permute.xlu1 %396 }
  0xdd   :  { %v2144_v19 = vpop.permute.xlu0 %382 }
  0xde   :  { %836 = vrot.lane.b32.xlu1 %v2476_v52, %s1402_s0  ;;  %v2501_v52 = vmov 0  }
  0xdf   :  { %386 = vrot.lane.b32.xlu0 %v1787_v23, %s1403_s28  ;;  %v430_v23 = vsel %vm426_vm7, %v1554_v16, %v1966_v45 }
  0xe0   :  { %v2151_v49 = vpop.permute.xlu1 %844  ;;  %v447_v47 = vsel %vm443_vm9, %v430_v23, %v1944_v37 }
  0xe1   :  { %v395_v40 = vpop.permute.xlu0 %394  ;;  %2499 = vst [vmem:[#allocation21_spill] sm:$0xff] %v2151_v49  ;;  %v428_v49 = vsel %vm426_vm7, 0, %v1931_v31  ;;  %v464_v16 = vsel %vm460_vm8, %v447_v47, %v1997_v15 }
  0xe2   :  { %848 = vrot.lane.b32.xlu1 %v1810_v56, %s1403_s28  ;;  %v445_v31 = vsel %vm443_vm9, %v428_v49, %v1929_v32  ;;  %v481_v45 = vsel %vm477_vm10, %v464_v16, %v2040_v53  ;;  %v881_v32 = vsel %vm426_vm7, %v1543_v7, %v1962_v44 }
  0xe3   :  { %834 = vrot.lane.b32.xlu0 %v2036_v27, %s1402_s0  ;;  %v462_v23 = vsel %vm460_vm8, %v445_v31, %v2005_v33  ;;  %v498_v47 = vsel %vm494_vm11, %v481_v45, %v2076_v62  ;;  %v895_v7 = vsel %vm443_vm9, %v881_v32, %v1940_v36 }
  0xe4   :  { %v855_v59 = vpop.permute.xlu1 %854 }
  0xe5   :  { %v2157_v63 = vpop.permute.xlu0 %842 }
  0xe6   :  { %2500 = vst [vmem:[#allocation22_spill] sm:$0xff] %v2157_v63  ;;  %392 = vrot.lane.b32.xlu1 %v2501_v52, %s1403_s28  ;;  %v515_v52 = vsel %vm511_vm12, %v498_v47, %v381_v22 }
  0xe7   :  { %846 = vrot.lane.b32.xlu0 %v1816_v50, %s1403_s28  ;;  %v532_v33 = vsel %vm528_vm13, %v515_v52, %v397_v28 }
  0xe8   :  { %v2168_v63 = vpop.permute.xlu1 %400 }
  0xe9   :  { %v853_v56 = vpop.permute.xlu0 %852 }
  0xea   :  { %404 = vrot.lane.b32.xlu1 %v1970_v46, %s1404_s29  ;;  %v479_v46 = vsel %vm477_vm10, %v462_v23, %v2049_v30 }
  0xeb   :  { %390 = vrot.lane.b32.xlu0 %v1829_v3, %s1403_s28  ;;  %v496_v53 = vsel %vm494_vm11, %v479_v46, %v2083_v11  ;;  %v909_v11 = vsel %vm460_vm8, %v445_v31, %v2027_v61 }
  0xec   :  { %v413_v15 = vpop.permute.xlu1 %412  ;;  %v513_v62 = vsel %vm511_vm12, %v496_v53, %v379_v21  ;;  %v2507_v53 = vld [vmem:[#allocation16_spill] sm:$0xff] }
  0xed   :  { %v2186_v37 = vpop.permute.xlu0 %398  ;;  %v549_v30 = vsel %vm545_vm14, %v532_v33, %v413_v15  ;;  %v530_v22 = vsel %vm528_vm13, %v513_v62, %v395_v40  ;;  %v925_v40 = vsel %vm477_vm10, %v909_v11, %v2065_v43  ;;  %v2503_v15 = vld [vmem:[#allocation15_spill] sm:$0xff]  ;;  %v2512_v11 = vrot.slane %v1829_v3, 1 }
  0xee   :  { %860 = vrot.lane.b32.xlu1 %v2003_v17, %s1404_s29  ;;  %v941_v61 = vsel %vm494_vm11, %v925_v40, %v2103_v8 }
  0xef   :  { %402 = vrot.lane.b32.xlu0 %v1982_v60, %s1404_s29  ;;  %v911_v60 = vsel %vm460_vm8, %v895_v7, %v2018_v51 }
  0xf0   :  { %v2204_v16 = vpop.permute.xlu1 %858  ;;  %v927_v28 = vsel %vm477_vm10, %v911_v60, %v2059_v42  ;;  %v2511_v60 = vld [vmem:[#allocation20_spill] sm:$0xff] }
  0xf1   :  { %v411_v49 = vpop.permute.xlu0 %410  ;;  %v943_v36 = vsel %vm494_vm11, %v927_v28, %v2096_v34  ;;  %v957_v34 = vsel %vm511_vm12, %v941_v61, %v2135_v35 }
  0xf2   :  { %v547_v44 = vsel %vm545_vm14, %v530_v22, %v411_v49  ;;  %406 = vrot.lane.b32.xlu1 %v2091_v1, %s1404_s29  ;;  %v959_v45 = vsel %vm511_vm12, %v943_v36, %v2128_v13  ;;  %v434_v1 = vsel %vm426_vm7, %v1566_v24, %v1978_v58  ;;  %v432_v24 = vsel %vm426_vm7, %v1578_v29, %v1974_v57  ;;  %v2509_v49 = vld [vmem:[#allocation18_spill] sm:$0xff] }
  0xf3   :  { %850 = vrot.lane.b32.xlu0 %v1846_v18, %s1403_s28  ;;  %v1297_v17 = vcombine.low %v547_v44, %v549_v30  ;;  %v974_v42 = vsel %vm528_vm13, %v959_v45, %v855_v59  ;;  %v972_v58 = vsel %vm528_vm13, %v957_v34, %v853_v56  ;;  %v451_v59 = vsel %vm443_vm9, %v434_v1, %v1949_v39  ;;  %v2513_v36 = vld [vmem:[#allocation22_spill] sm:$0xff] }
  0xf4   :  { %v869_v51 = vpop.permute.xlu1 %868  ;;  %v449_v29 = vsel %vm443_vm9, %v432_v24, %v1953_v6 }
  0xf5   :  { %1335 = vmatprep.mubr.msk.bf16.mxu0 %vm1061_vm15, %v1297_v17  ;;  %v857_v21 = vpop.permute.xlu0 %856  ;;  %v989_v43 = vsel %vm545_vm14, %v974_v42, %v869_v51  ;;  %v466_v39 = vsel %vm460_vm8, %v449_v29, %v2038_v55  ;;  %v2517_v29 = vld [vmem:[#allocation7_spill] sm:$0xff] }
  0xf6   :  { %418 = vrot.lane.b32.xlu1 %v2025_v10, %s1405_s6  ;;  %v468_v10 = vsel %vm460_vm8, %v451_v59, %v2029_v25  ;;  %v483_v23 = vsel %vm477_vm10, %v466_v39, %v2074_v54  ;;  %v2516_v59 = vld [vmem:[#allocation8_spill] sm:$0xff] }
  0xf7   :  { %862 = vrot.lane.b32.xlu0 %v1992_v9, %s1404_s29  ;;  %v485_v56 = vsel %vm477_vm10, %v468_v10, %v2067_v48  ;;  %v500_v6 = vsel %vm494_vm11, %v483_v23, %v2113_v4  ;;  %v2519_v23 = vld [vmem:[#allocation9_spill] sm:$0xff] }
  0xf8   :  { %v284_v13 = vpop.permute.xlu1 %283  ;;  %v502_v57 = vsel %vm494_vm11, %v485_v56, %v2105_v41  ;;  %v517_v55 = vsel %vm511_vm12, %v500_v6, %v2144_v19 }
  0xf9   :  { %v867_v8 = vpop.permute.xlu0 %866  ;;  %v534_v54 = vsel %vm528_vm13, %v517_v55, %v2186_v37 }
  0xfa   :  { %v987_v9 = vsel %vm545_vm14, %v972_v58, %v867_v8  ;;  %864 = vrot.lane.b32.xlu1 %v2111_v0, %s1404_s29  ;;  %v519_v0 = vsel %vm511_vm12, %v502_v57, %v2137_v38  ;;  %v885_v38 = vsel %vm426_vm7, %v1668_v26, %v1995_v14  ;;  %v2504_v26 = vld [vmem:[#allocation14_spill] sm:$0xff]  ;;  %v2505_v14 = vld [vmem:[#allocation13_spill] sm:$0xff]  ;;  %v2518_v57 = vld [vmem:[#allocation11_spill] sm:$0xff] }
  0xfb   :  { %408 = vrot.lane.b32.xlu0 %v1437_v2, %s1404_s29  ;;  %v1301_v35 = vcombine.low %v987_v9, %v989_v43  ;;  %v536_v48 = vsel %vm528_vm13, %v519_v0, %v2168_v63  ;;  %v2514_v43 = vrot.slane %v1846_v18, 1 }
  0xfc   :  { %v417_v31 = vpop.permute.xlu1 %416 }
  0xfd   :  { %1343 = vmatprep.mubr.msk.bf16.mxu1 %vm1061_vm15, %v1301_v35  ;;  %v282_v25 = vpop.permute.xlu0 %281  ;;  %v553_v41 = vsel %vm545_vm14, %v536_v48, %v417_v31 }
  0xfe   :  { %876 = vrot.lane.b32.xlu1 %v2036_v27, %s1405_s6  ;;  %v2502_v27 = vld [vmem:[#allocation5_spill] sm:$0xff] }
  0xff   :  { %420 = vrot.lane.b32.xlu0 %v2014_v20, %s1405_s6  ;;  %v899_v20 = vsel %vm443_vm9, %v885_v38, %v2007_v12  ;;  %v883_v19 = vsel %vm426_vm7, %v2502_v27, %v1986_v5  ;;  %v2506_v12 = vld [vmem:[#allocation17_spill] sm:$0xff]  ;;  %v2508_v5 = vld [vmem:[#allocation19_spill] sm:$0xff] }
 0x100   :  { %v748_v63 = vpop.permute.xlu1 %747  ;;  %v915_v46 = vsel %vm460_vm8, %v899_v20, %v2503_v15  ;;  %v897_v37 = vsel %vm443_vm9, %v883_v19, %v2505_v14 }
 0x101   :  { %v415_v4 = vpop.permute.xlu0 %414  ;;  %v931_v32 = vsel %vm477_vm10, %v915_v46, %v2506_v12  ;;  %v913_v33 = vsel %vm460_vm8, %v897_v37, %v2507_v53  ;;  %v889_v18 = vsel %vm426_vm7, %v2517_v29, %v748_v63 }
 0x102   :  { %v551_v47 = vsel %vm545_vm14, %v534_v54, %v415_v4  ;;  %424 = vrot.lane.b32.xlu1 %v1437_v2, %s1405_s6  ;;  %v947_v62 = vsel %vm494_vm11, %v931_v32, %v2508_v5  ;;  %v929_v7 = vsel %vm477_vm10, %v913_v33, %v2509_v49  ;;  %v2510_v2 = vld [vmem:[#allocation21_spill] sm:$0xff] }
 0x103   :  { %v1298_v52 = vcombine.low %v551_v47, %v553_v41  ;;  %874 = vrot.lane.b32.xlu0 %v2504_v26, %s1405_s6  ;;  %v963_v44 = vsel %vm511_vm12, %v947_v62, %v2510_v2  ;;  %v945_v17 = vsel %vm494_vm11, %v929_v7, %v2511_v60  ;;  %v2520_v41 = vld [vmem:[#allocation10_spill] sm:$0xff]  ;;  %v2521_v47 = vld [vmem:[#allocation12_spill] sm:$0xff] }
 0x104   :  { %v873_v22 = vpop.permute.xlu1 %872  ;;  %v978_v28 = vsel %vm528_vm13, %v963_v44, %v2204_v16  ;;  %v961_v51 = vsel %vm511_vm12, %v945_v17, %v2513_v36  ;;  %v2515_v16 = vld [vmem:[#allocation6_spill] sm:$0xff] }
 0x105   :  { %1336 = vmatmul.mubr.msk.bf16.vlgmr.msra.gmra.mrb[0].mxu0 %vm1061_vm15, %v1298_v52  ;;  %v746_v30 = vpop.permute.xlu0 %745  ;;  %v993_v40 = vsel %vm545_vm14, %v978_v28, %v873_v22  ;;  %v976_v45 = vsel %vm528_vm13, %v961_v51, %v857_v21  ;;  %v438_v3 = vsel %vm426_vm7, %v2515_v16, %v284_v13  ;;  %v436_v21 = vsel %vm426_vm7, %v2516_v59, %v282_v25 }
 0x106   :  { %v887_v31 = vsel %vm426_vm7, %v2518_v57, %v746_v30 }
 0x107   :  { %422 = vrot.lane.b32.xlu0 %v2512_v11, %s1405_s6 }
 0x108   :  { %v288_v61 = vpop.permute.xlu1 %287 }
 0x109   :  { %v871_v1 = vpop.permute.xlu0 %870  ;;  %v442_v0 = vsel %vm426_vm7, %v2519_v23, %v288_v61 }
 0x10a   :  { %v991_v42 = vsel %vm545_vm14, %v976_v45, %v871_v1 }
 0x10b   :  { %v1302_v34 = vcombine.low %v991_v42, %v993_v40  ;;  %878 = vrot.lane.b32.xlu0 %v2514_v43, %s1405_s6 }
 0x10c   :  { %v316_v58 = vpop.permute.xlu1 %315 }
 0x10d   :  { %1344 = vmatmul.mubr.msk.bf16.vlgmr.msra.gmra.mrb[0].mxu1 %vm1061_vm15, %v1302_v34  ;;  %v286_v24 = vpop.permute.xlu0 %285  ;;  %v455_v8 = vsel %vm443_vm9, %v438_v3, %v316_v58 }
 0x10e   :  { %v440_v38 = vsel %vm426_vm7, %v2520_v41, %v286_v24 }
 0x110   :  { %v752_v10 = vpop.permute.xlu1 %751 }
 0x111   :  { %v314_v9 = vpop.permute.xlu0 %313  ;;  %v893_v27 = vsel %vm426_vm7, %v2521_v47, %v752_v10 }
 0x112   :  { %v453_v35 = vsel %vm443_vm9, %v436_v21, %v314_v9 }
 0x114   :  { %v776_v39 = vpop.permute.xlu1 %775 }
 0x115   :  { %v750_v56 = vpop.permute.xlu0 %749  ;;  %v903_v13 = vsel %vm443_vm9, %v889_v18, %v776_v39 }
 0x116   :  { %v891_v26 = vsel %vm426_vm7, %v1816_v50, %v750_v56 }
 0x118   :  { %v320_v48 = vpop.permute.xlu1 %319 }
 0x119   :  { %v774_v6 = vpop.permute.xlu0 %773  ;;  %v459_v55 = vsel %vm443_vm9, %v442_v0, %v320_v48 }
 0x11a   :  { %v901_v25 = vsel %vm443_vm9, %v887_v31, %v774_v6 }
 0x11c   :  { %v333_v4 = vpop.permute.xlu1 %332 }
 0x11d   :  { %v318_v54 = vpop.permute.xlu0 %317  ;;  %v472_v20 = vsel %vm460_vm8, %v455_v8, %v333_v4 }
 0x11e   :  { %v457_v63 = vsel %vm443_vm9, %v440_v38, %v318_v54 }
 0x120   :  { %v780_v15 = vpop.permute.xlu1 %779 }
 0x121   :  { %v331_v19 = vpop.permute.xlu0 %330  ;;  %v907_v52 = vsel %vm443_vm9, %v893_v27, %v780_v15 }
 0x122   :  { %v470_v46 = vsel %vm460_vm8, %v453_v35, %v331_v19 }
 0x124   :  { %v793_v37 = vpop.permute.xlu1 %792 }
 0x125   :  { %v778_v14 = vpop.permute.xlu0 %777  ;;  %v919_v32 = vsel %vm460_vm8, %v903_v13, %v793_v37 }
 0x126   :  { %v905_v12 = vsel %vm443_vm9, %v891_v26, %v778_v14 }
 0x128   :  { %v337_v33 = vpop.permute.xlu1 %336 }
 0x129   :  { %v791_v53 = vpop.permute.xlu0 %790  ;;  %v476_v62 = vsel %vm460_vm8, %v459_v55, %v337_v33 }
 0x12a   :  { %v917_v5 = vsel %vm460_vm8, %v901_v25, %v791_v53 }
 0x12c   :  { %v356_v22 = vpop.permute.xlu1 %355 }
 0x12d   :  { %v335_v30 = vpop.permute.xlu0 %334  ;;  %v489_v23 = vsel %vm477_vm10, %v472_v20, %v356_v22 }
 0x12e   :  { %v2352_v49 = vsel %vm460_vm8, %v457_v63, %v335_v30 }
 0x130   :  { %v797_v2 = vpop.permute.xlu1 %796 }
 0x131   :  { %v354_v7 = vpop.permute.xlu0 %353  ;;  %v2355_v50 = vsel %vm460_vm8, %v907_v52, %v797_v2 }
 0x132   :  { %v487_v0 = vsel %vm477_vm10, %v470_v46, %v354_v7 }
 0x134   :  { %v816_v60 = vpop.permute.xlu1 %815 }
 0x135   :  { %v795_v44 = vpop.permute.xlu0 %794  ;;  %v935_v25 = vsel %vm477_vm10, %v919_v32, %v816_v60 }
 0x136   :  { %v2358_v17 = vsel %vm460_vm8, %v905_v12, %v795_v44 }
 0x138   :  { %v360_v11 = vpop.permute.xlu1 %359 }
 0x139   :  { %v814_v28 = vpop.permute.xlu0 %813  ;;  %v493_v14 = vsel %vm477_vm10, %v476_v62, %v360_v11 }
 0x13a   :  { %v933_v47 = vsel %vm477_vm10, %v917_v5, %v814_v28 }
 0x13c   :  { %v373_v51 = vpop.permute.xlu1 %372 }
 0x13d   :  { %v358_v36 = vpop.permute.xlu0 %357  ;;  %v506_v6 = vsel %vm494_vm11, %v489_v23, %v373_v51 }
 0x13e   :  { %v491_v30 = vsel %vm477_vm10, %v2352_v49, %v358_v36 }
 0x140   :  { %v820_v45 = vpop.permute.xlu1 %819 }
 0x141   :  { %v371_v40 = vpop.permute.xlu0 %370  ;;  %v939_v49 = vsel %vm477_vm10, %v2355_v50, %v820_v45 }
 0x142   :  { %v504_v48 = vsel %vm494_vm11, %v487_v0, %v371_v40 }
 0x144   :  { %v833_v61 = vpop.permute.xlu1 %832 }
 0x145   :  { %v818_v1 = vpop.permute.xlu0 %817  ;;  %v951_v38 = vsel %vm494_vm11, %v935_v25, %v833_v61 }
 0x146   :  { %v937_v36 = vsel %vm477_vm10, %v2358_v17, %v818_v1 }
 0x148   :  { %v377_v34 = vpop.permute.xlu1 %376 }
 0x149   :  { %v831_v42 = vpop.permute.xlu0 %830  ;;  %v510_v32 = vsel %vm494_vm11, %v493_v14, %v377_v34 }
 0x14a   :  { %v949_v46 = vsel %vm494_vm11, %v933_v47, %v831_v42 }
 0x14c   :  { %v389_v16 = vpop.permute.xlu1 %388 }
 0x14d   :  { %v375_v43 = vpop.permute.xlu0 %374  ;;  %v523_v55 = vsel %vm511_vm12, %v506_v6, %v389_v16 }
 0x14e   :  { %v508_v62 = vsel %vm494_vm11, %v491_v30, %v375_v43 }
 0x150   :  { %v837_v24 = vpop.permute.xlu1 %836 }
 0x151   :  { %v387_v3 = vpop.permute.xlu0 %386  ;;  %v955_v61 = vsel %vm494_vm11, %v939_v49, %v837_v24  ;;  %v2410_v24 = vld [vmem:[%s2464_s2] ss:$0 sm:$0xff]  ;;  %s1406_s2 = smov [#allocation2]  }
 0x152   :  { %v521_v41 = vsel %vm511_vm12, %v504_v48, %v387_v3 }
 0x154   :  { %v849_v8 = vpop.permute.xlu1 %848 }
 0x155   :  { %v835_v58 = vpop.permute.xlu0 %834  ;;  %v967_v27 = vsel %vm511_vm12, %v951_v38, %v849_v8 }
 0x156   :  { %v953_v42 = vsel %vm494_vm11, %v937_v36, %v835_v58 }
 0x158   :  { %v393_v21 = vpop.permute.xlu1 %392 }
 0x159   :  { %v847_v59 = vpop.permute.xlu0 %846  ;;  %v527_v22 = vsel %vm511_vm12, %v510_v32, %v393_v21  ;;  %v970_v43 = vsel %vm511_vm12, %v955_v61, %v393_v21 }
 0x15a   :  { %v965_v37 = vsel %vm511_vm12, %v949_v46, %v847_v59  ;;  %v2415_v59 = vld [vmem:[%s2465_s3] ss:$0 sm:$0xff]  ;;  %s1270_s3 = sshll.u32 %s1406_s2, 4  ;;  %s1271_s3 = int_to_ptr.vmem [resolvable:$true] %s1270_s3 }
 0x15b   :  { %s1373_s12 = scalar_lea.vmem %s1271_s3, 2048  ;;  %p1378_p1 = scmp.lt.s32.totalorder %s1271_s3, %s1271_s3 }
 0x15c   :  { %v405_v10 = vpop.permute.xlu1 %404  ;;  %p1374_p0 = scmp.ne.s32.totalorder %s1271_s3, %s1373_s12  ;;  %p1379_p2 = scmp.lt.s32.totalorder %s1373_s12, %s1373_s12 }
 0x15d   :  { %v391_v9 = vpop.permute.xlu0 %390  ;;  %v540_v54 = vsel %vm528_vm13, %v523_v55, %v405_v10 }
 0x15e   :  { %v525_v60 = vsel %vm511_vm12, %v508_v62, %v391_v9  ;;  %p1380_p3 = por %p1379_p2, %p1378_p1 }
 0x160   :  { %v861_v29 = vpop.permute.xlu1 %860  ;;  %p1381_p4 = pnand %p1380_p3, %p1374_p0 }
 0x161   :  { %v403_v35 = vpop.permute.xlu0 %402  ;;  %v980_v53 = vsel %vm528_vm13, %v965_v37, %v861_v29 }
 0x162   :  { %v538_v4 = vsel %vm528_vm13, %v521_v41, %v403_v35 }
 0x164   :  { %v407_v56 = vpop.permute.xlu1 %406 }
 0x165   :  { %v851_v18 = vpop.permute.xlu0 %850  ;;  %v542_v11 = vsel %vm528_vm13, %v525_v60, %v407_v56 }
 0x166   :  { %v969_v16 = vsel %vm511_vm12, %v953_v42, %v851_v18 }
 0x168   :  { %v419_v13 = vpop.permute.xlu1 %418 }
 0x169   :  { %v863_v39 = vpop.permute.xlu0 %862  ;;  %v555_v19 = vsel %vm545_vm14, %v538_v4, %v419_v13 }
 0x16a   :  { %v982_v52 = vsel %vm528_vm13, %v967_v27, %v863_v39 }
 0x16c   :  { %v865_v31 = vpop.permute.xlu1 %864 }
 0x16d   :  { %v409_v57 = vpop.permute.xlu0 %408  ;;  %v984_v8 = vsel %vm528_vm13, %v969_v16, %v865_v31 }
 0x16e   :  { %v544_v2 = vsel %vm528_vm13, %v527_v22, %v409_v57  ;;  %v985_v3 = vsel %vm528_vm13, %v970_v43, %v409_v57 }
 0x170   :  { %v877_v20 = vpop.permute.xlu1 %876 }
 0x171   :  { %v421_v63 = vpop.permute.xlu0 %420  ;;  %v997_v12 = vsel %vm545_vm14, %v982_v52, %v877_v20 }
 0x172   :  { %v557_v15 = vsel %vm545_vm14, %v540_v54, %v421_v63 }
 0x173   :  { %v1299_v26 = vcombine.low %v555_v19, %v557_v15 }
 0x174   :  { %v425_v5 = vpop.permute.xlu1 %424 }
 0x175   :  { %1339 = vmatprep.mubr.msk.bf16.mxu0 %vm1061_vm15, %v1299_v26  ;;  %v875_v33 = vpop.permute.xlu0 %874  ;;  %v561_v28 = vsel %vm545_vm14, %v544_v2, %v425_v5  ;;  %v1000_v17 = vsel %vm545_vm14, %v985_v3, %v425_v5 }
 0x176   :  { %v995_v7 = vsel %vm545_vm14, %v980_v53, %v875_v33 }
 0x177   :  { %v1303_v44 = vcombine.low %v995_v7, %v997_v12 }
 0x179   :  { %1347 = vmatprep.mubr.msk.bf16.mxu1 %vm1061_vm15, %v1303_v44  ;;  %v423_v51 = vpop.permute.xlu0 %422 }
 0x17a   :  { %v559_v40 = vsel %vm545_vm14, %v542_v11, %v423_v51 }
 0x17b   :  { %v1300_v34 = vcombine.low %v559_v40, %v561_v28 }
 0x17d   :  { %1340 = vmatmul.mubr.msk.bf16.gmra.mrb[4].mxu0 %vm1061_vm15, %v1300_v34  ;;  %v879_v50 = vpop.permute.xlu0 %878 }
 0x17e   :  { %v999_v45 = vsel %vm545_vm14, %v984_v8, %v879_v50 }
 0x17f   :  { %v1304_v1 = vcombine.low %v999_v45, %v1000_v17 }
 0x181   :  { %1348 = vmatmul.mubr.msk.bf16.gmra.mrb[4].mxu1 %vm1061_vm15, %v1304_v1 }
 0x1d8   :  { %v1337_v58 = vpop.f32.mrb[0].mxu0 }
 0x1d9   :  { %v1196_v21 = vmul.f32 %v1337_v58, %v2410_v24  ;;  %v1124_v9 = vpop.f32.mrb[1].mxu0 }
 0x1da   :  { %v1194_v10 = vmul.f32 %v2410_v24, %v1124_v9  ;;  %v1338_v35 = vpop.f32.mrb[2].mxu0 }
 0x1db   :  { %v1219_v29 = vadd.f32 %v2415_v59, %v1196_v21  ;;  %v1197_v18 = vmul.f32 %v1338_v35, %v2410_v24  ;;  %v1127_v56 = vpop.f32.mrb[3].mxu0 }
 0x1dc   :  { %v1217_v39 = vadd.f32 %v2415_v59, %v1194_v10  ;;  %v1195_v13 = vmul.f32 %v2410_v24, %v1127_v56 }
 0x1dd   :  { %v1235_v57 = vmax.f32 %v1219_v29, 0.0  ;;  %v1220_v31 = vadd.f32 %v2415_v59, %v1197_v18 }
 0x1de   :  { %v1233_v23 = vmax.f32 %v1217_v39, 0.0  ;;  %v1218_v0 = vadd.f32 %v2415_v59, %v1195_v13 }
 0x1df   :  { %1251 = vst [vmem:[#allocation2 + $0x10] sm:$0xff] %v1235_v57  ;;  %v1236_v6 = vmax.f32 %v1220_v31, 0.0 }
 0x1e0   :  { %1249 = vst [vmem:[#allocation2] sm:$0xff] %v1233_v23  ;;  %v1234_v48 = vmax.f32 %v1218_v0, 0.0  ;;  %v1345_v25 = vpop.f32.mrb[0].mxu1 }
 0x1e1   :  { %1252 = vst [vmem:[#allocation2 + $0x18] sm:$0xff] %v1236_v6  ;;  %v1204_v55 = vmul.f32 %v1345_v25, %v2410_v24  ;;  %v1156_v41 = vpop.f32.mrb[1].mxu1 }
 0x1e2   :  { %1250 = vst [vmem:[#allocation2 + $0x8] sm:$0xff] %v1234_v48  ;;  %v1202_v38 = vmul.f32 %v2410_v24, %v1156_v41  ;;  %v1346_v54 = vpop.f32.mrb[2].mxu1 }
 0x1e3   :  { %v1227_v4 = vadd.f32 %v2415_v59, %v1204_v55  ;;  %v1205_v63 = vmul.f32 %v1346_v54, %v2410_v24  ;;  %v1159_v20 = vpop.f32.mrb[3].mxu1 }
 0x1e4   :  { %v1225_v47 = vadd.f32 %v2415_v59, %v1202_v38  ;;  %v1203_v27 = vmul.f32 %v2410_v24, %v1159_v20 }
 0x1e5   :  { %v1243_v19 = vmax.f32 %v1227_v4, 0.0  ;;  %v1228_v15 = vadd.f32 %v2415_v59, %v1205_v63 }
 0x1e6   :  { %v1241_v46 = vmax.f32 %v1225_v47, 0.0  ;;  %v1226_v52 = vadd.f32 %v2415_v59, %v1203_v27 }
 0x1e7   :  { %1259 = vst [vmem:[#allocation2 + $0x50] sm:$0xff] %v1243_v19  ;;  %v1244_v26 = vmax.f32 %v1228_v15, 0.0 }
 0x1e8   :  { %1257 = vst [vmem:[#allocation2 + $0x40] sm:$0xff] %v1241_v46  ;;  %v1242_v14 = vmax.f32 %v1226_v52, 0.0 }
 0x1e9   :  { %1260 = vst [vmem:[#allocation2 + $0x58] sm:$0xff] %v1244_v26 }
 0x1ea   :  { %1258 = vst [vmem:[#allocation2 + $0x48] sm:$0xff] %v1242_v14 }
 0x250   :  { %v1341_v37 = vpop.f32.mrb[4].mxu0 }
 0x251   :  { %v1200_v12 = vmul.f32 %v1341_v37, %v2410_v24  ;;  %v1140_v32 = vpop.f32.mrb[5].mxu0 }
 0x252   :  { %v1198_v53 = vmul.f32 %v2410_v24, %v1140_v32  ;;  %v1342_v33 = vpop.f32.mrb[6].mxu0 }
 0x253   :  { %v1223_v5 = vadd.f32 %v2415_v59, %v1200_v12  ;;  %v1201_v30 = vmul.f32 %v1342_v33, %v2410_v24  ;;  %v1143_v22 = vpop.f32.mrb[7].mxu0 }
 0x254   :  { %v1221_v7 = vadd.f32 %v2415_v59, %v1198_v53  ;;  %v1199_v62 = vmul.f32 %v2410_v24, %v1143_v22  ;;  %v1349_v2 = vpop.f32.mrb[4].mxu1 }
 0x255   :  { %v1239_v44 = vmax.f32 %v1223_v5, 0.0  ;;  %v1224_v60 = vadd.f32 %v2415_v59, %v1201_v30  ;;  %v1208_v28 = vmul.f32 %v1349_v2, %v2410_v24  ;;  %v1172_v11 = vpop.f32.mrb[5].mxu1 }
 0x256   :  { %v1237_v51 = vmax.f32 %v1221_v7, 0.0  ;;  %v1222_v49 = vadd.f32 %v2415_v59, %v1199_v62  ;;  %v1206_v36 = vmul.f32 %v2410_v24, %v1172_v11  ;;  %v1350_v40 = vpop.f32.mrb[6].mxu1 }
 0x257   :  { %1255 = vst [vmem:[#allocation2 + $0x30] sm:$0xff] %v1239_v44  ;;  %v1240_v61 = vmax.f32 %v1224_v60, 0.0  ;;  %v1231_v42 = vadd.f32 %v2415_v59, %v1208_v28  ;;  %v1209_v34 = vmul.f32 %v1350_v40, %v2410_v24  ;;  %v1175_v43 = vpop.f32.mrb[7].mxu1 }
 0x258   :  { %1253 = vst [vmem:[#allocation2 + $0x20] sm:$0xff] %v1237_v51  ;;  %v1238_v16 = vmax.f32 %v1222_v49, 0.0  ;;  %v1229_v3 = vadd.f32 %v2415_v59, %v1206_v36  ;;  %v1207_v8 = vmul.f32 %v2410_v24, %v1175_v43 }
 0x259   :  { %1256 = vst [vmem:[#allocation2 + $0x38] sm:$0xff] %v1240_v61  ;;  %v1247_v50 = vmax.f32 %v1231_v42, 0.0  ;;  %v1232_v17 = vadd.f32 %v2415_v59, %v1209_v34 }
 0x25a   :  { %1254 = vst [vmem:[#allocation2 + $0x28] sm:$0xff] %v1238_v16  ;;  %v1245_v45 = vmax.f32 %v1229_v3, 0.0  ;;  %v1230_v1 = vadd.f32 %v2415_v59, %v1207_v8 }
 0x25b   :  { %1263 = vst [vmem:[#allocation2 + $0x70] sm:$0xff] %v1247_v50  ;;  %v1248_v58 = vmax.f32 %v1232_v17, 0.0 }
 0x25c   :  { %1261 = vst [vmem:[#allocation2 + $0x60] sm:$0xff] %v1245_v45  ;;  %v1246_v21 = vmax.f32 %v1230_v1, 0.0 }
 0x25d   :  { %1264 = vst [vmem:[#allocation2 + $0x78] sm:$0xff] %v1248_v58 }
 0x25e   :  { %1262 = vst [vmem:[#allocation2 + $0x68] sm:$0xff] %v1246_v21 }
 0x25f   :  { %1384 = shalt.err (!%p1381_p4)
}
 0x260   :  { %s1385_s16 = scalar_lea.hbm %s2466_s4, 2048 }
 0x261   :  { %p1386_p5 = scmp.ne.s32.totalorder %s2466_s4, %s1385_s16  ;;  %p1389_p6 = scmp.lt.u32.totalorder %s1385_s16, %s2466_s4 }
 0x263   :  { %p1391_p7 = pnand %p1389_p6, %p1386_p5 }
 0x265   :  { %1394 = shalt.err (!%p1391_p7)
}
 0x266   :  { %s1407_s21 = smov 128  }
 0x267   :  { %1276 = dma.vmem_to_hbm [thread:$0]  %s1271_s3, 2048, %s2466_s4, [#allocation3], %s1407_s21, %s1407_s21, %s1398_s23  }
 0x268   :  { %1395 = dma.done.wait [#allocation3], 2048  }
 0x269   :  { %1396 = vsyncadd [#allocation3], 4294965248 }
 0x26a   :  { %1280 = vsyncpa [#allocation3], 1 }

</bundles_post_ra>
